<compile_context>
chip_gen: v7x
topology: tpu7x:2x2x1
jax: 0.10.0
libtpu: 0.0.40
codegen_flags: <defaults>
</compile_context>

<pallas_src>
import math

import jax
import jax.numpy as jnp
from jax.experimental import pallas as pl
from jax.experimental.pallas import tpu as pltpu


def _round_up(a, b):
    return (a + b - 1) // b * b


# ---------------------------------------------------------------------------
# Kernels
# ---------------------------------------------------------------------------
def _make_edgeconv_kernel(fuse_proj):
    """EdgeConv(max) + bias/ReLU finalize; optionally fuses h @ W_head (layer 2).

    Grid: (i target-row tiles ["parallel"], j source-col tiles ["arbitrary" reduction]).
    EdgeConv message for edge (j->i): mlp(cat([x_i, x_j - x_i])) with the first Linear
    decomposed as x_i @ W_top + (x_j - x_i) @ W_bot = base_i + q_j,
    base = p - q + b1, p = x @ W_top, q = x @ W_bot.
    """

    def kernel(cnt_ref, xi_ref, xj_ref, adj_ref, deg_ref,
               w1_ref, b1_ref, w2_ref, b2_ref, *rest):
        if fuse_proj:
            wp_ref = rest[0]
            o_ref, acc_ref, base_ref = rest[1:]
        else:
            wp_ref = None
            o_ref, acc_ref, base_ref = rest

        i = pl.program_id(0)
        j = pl.program_id(1)
        nj = pl.num_programs(1)
        hid = b1_ref.shape[1]                      # lane-padded hidden width (x128)

        @pl.when(j == 0)
        def _init():
            # Hoisted i-invariant work: one fused MXU pass gives both p and q.
            xi = xi_ref[...].astype(jnp.bfloat16)
            pq = jnp.dot(xi, w1_ref[...], preferred_element_type=jnp.float32)
            base_ref[...] = pq[:, :hid] - pq[:, hid:] + b1_ref[...]
            acc_ref[...] = jnp.full(acc_ref.shape, -1e30, acc_ref.dtype)

        # Skip adjacency tiles that contain no edges (scalar-prefetched block counts).
        @pl.when(cnt_ref[i * nj + j] > 0)
        def _compute():
            xj = xj_ref[...].astype(jnp.bfloat16)
            q_j = jnp.dot(xj, w1_ref[:, hid:], preferred_element_type=jnp.float32)
            # Pairwise broadcast + ReLU in bf16 (the VALU-bound part of the kernel).
            base_b = base_ref[...].astype(jnp.bfloat16)                  # (TI, hid)
            h1 = jnp.maximum(base_b[:, None, :]
                             + q_j.astype(jnp.bfloat16)[None, :, :], 0)  # (TI, TJ, hid)
            ti, tj = adj_ref.shape
            msg = jnp.dot(h1.reshape(ti * tj, hid), w2_ref[...],
                          preferred_element_type=jnp.float32).reshape(ti, tj, -1)
            adj = adj_ref[...]                                           # (TI, TJ) 0/1 bf16
            masked = jnp.where(adj[:, :, None] > 0.5, msg, -1e30)
            acc_ref[...] = jnp.maximum(acc_ref[...], jnp.max(masked, axis=1))

        @pl.when(j == nj - 1)
        def _finalize():
            # b2 is constant over j, so max_j(msg) + b2 == max_j(msg + b2).
            # TODO(synk): PyG fills empty neighborhoods with 0 under max aggregation;
            # rows with in-degree 0 are set to 0 here (before the outer ReLU).
            has_nbr = deg_ref[...] > 0.5                                 # (TI, 1)
            h = jnp.maximum(jnp.where(has_nbr, acc_ref[...] + b2_ref[...], 0.0), 0.0)
            if fuse_proj:
                # Fused GCN-head projection: layer 2 writes hw = relu(h) @ [W_mu|W_ls].
                o_ref[...] = jnp.dot(h.astype(jnp.bfloat16), wp_ref[...],
                                     preferred_element_type=jnp.float32
                                     ).astype(o_ref.dtype)
            else:
                o_ref[...] = h.astype(o_ref.dtype)

    return kernel


def gcn_head_kernel(gadj_ref, hw_ref, b_ref, o_ref):
    """One row tile of the fused mu/logstd heads: gadj @ hw + [b_mu | b_ls]."""
    o_ref[...] = jnp.dot(gadj_ref[...], hw_ref[...],
                         preferred_element_type=jnp.float32) + b_ref[...]


# ---------------------------------------------------------------------------
# pallas_call wrappers
# ---------------------------------------------------------------------------
def _vmem_limit_bytes(tile_i, tile_j, hid_pad, out_pad):
    # pre/h1 are bf16, msg/masked are f32; blocks + weights + scratch are small.
    pairwise = tile_i * tile_j * (2 * 2 * hid_pad + 2 * 4 * out_pad)
    est = pairwise + (12 << 20)
    # Keep comfortably under v7x's 64 MiB physical VMEM (v5e/v6e have 128 MiB).
    return int(min(max(est, 24 << 20), 44 << 20))


def _edgeconv_layer(cnt, x_p, adj_p, deg_p, w1, b1, w2, b2, w_proj,
                    tile_i, tile_j, vmem_limit, out_dtype):
    n_pad, c = x_p.shape
    hid_pad = b1.shape[1]
    acc_cols = w2.shape[1]
    out_cols = w_proj.shape[1] if w_proj is not None else acc_cols
    grid = (n_pad // tile_i, n_pad // tile_j)

    in_specs = [
        pl.BlockSpec((tile_i, c), lambda i, j, c_r: (i, 0)),        # target rows x_i
        pl.BlockSpec((tile_j, c), lambda i, j, c_r: (j, 0)),        # source rows x_j
        pl.BlockSpec((tile_i, tile_j), lambda i, j, c_r: (i, j)),   # adjacency block
        pl.BlockSpec((tile_i, 1), lambda i, j, c_r: (i, 0)),        # in-degree
        pl.BlockSpec(w1.shape, lambda i, j, c_r: (0, 0)),
        pl.BlockSpec(b1.shape, lambda i, j, c_r: (0, 0)),
        pl.BlockSpec(w2.shape, lambda i, j, c_r: (0, 0)),
        pl.BlockSpec(b2.shape, lambda i, j, c_r: (0, 0)),
    ]
    args = [cnt, x_p, x_p, adj_p, deg_p, w1, b1, w2, b2]
    if w_proj is not None:
        in_specs.append(pl.BlockSpec(w_proj.shape, lambda i, j, c_r: (0, 0)))
        args.append(w_proj)

    return pl.pallas_call(
        _make_edgeconv_kernel(w_proj is not None),
        grid_spec=pltpu.PrefetchScalarGridSpec(
            num_scalar_prefetch=1,
            grid=grid,
            in_specs=in_specs,
            out_specs=pl.BlockSpec((tile_i, out_cols), lambda i, j, c_r: (i, 0)),
            scratch_shapes=[pltpu.VMEM((tile_i, acc_cols), jnp.float32),   # running max
                            pltpu.VMEM((tile_i, hid_pad), jnp.float32)]),  # hoisted base_i
        out_shape=jax.ShapeDtypeStruct((n_pad, out_cols), out_dtype),
        compiler_params=pltpu.CompilerParams(
            dimension_semantics=("parallel", "arbitrary"),
            vmem_limit_bytes=vmem_limit),
    )(*args)


def _gcn_head(gadj_p, hw_p, b_head, tile_i, vmem_limit):
    n_pad = gadj_p.shape[0]
    out2 = hw_p.shape[1]
    return pl.pallas_call(
        gcn_head_kernel,
        grid=(n_pad // tile_i,),
        in_specs=[
            pl.BlockSpec((tile_i, n_pad), lambda i: (i, 0)),   # normalized adj rows (bf16)
            pl.BlockSpec((n_pad, out2), lambda i: (0, 0)),     # pre-projected features hw
            pl.BlockSpec(b_head.shape, lambda i: (0, 0)),
        ],
        out_specs=pl.BlockSpec((tile_i, out2), lambda i: (i, 0)),
        out_shape=jax.ShapeDtypeStruct((n_pad, out2), jnp.float32),
        compiler_params=pltpu.CompilerParams(
            dimension_semantics=("parallel",),
            vmem_limit_bytes=vmem_limit),
    )(gadj_p, hw_p, b_head)


def _pack_edge_layer(w_top, w_bot, b_a, w_b, b_b, in_pad, hid_pad, out_pad):
    """Fuse [W_top | W_bot]; zero-pad every matrix to 128-lane multiples (bf16 MXU)."""
    c, hid = w_top.shape
    out = w_b.shape[1]
    w1 = jnp.zeros((in_pad, 2 * hid_pad), jnp.float32)
    w1 = w1.at[:c, :hid].set(w_top).at[:c, hid_pad:hid_pad + hid].set(w_bot)
    b1 = jnp.zeros((1, hid_pad), jnp.float32).at[:, :hid].set(b_a)
    w2 = jnp.zeros((hid_pad, out_pad), jnp.float32).at[:hid, :out].set(w_b)
    b2 = jnp.zeros((1, out_pad), jnp.float32).at[:, :out].set(b_b)
    return w1.astype(jnp.bfloat16), b1, w2.astype(jnp.bfloat16), b2


def vpfae_edge_forward(x, edge_index, params, *, tile_i=None, tile_j=None):
    N, C = x.shape
    out_channels = params["w_mu"].shape[1]
    l1 = params["w1b"].shape[1]
    l2 = params["w2b"].shape[1]

    # ---- tile heuristics: (64,128) keeps the pairwise working set ~13 MiB (v7x-safe,
    #      even i extent for 2-TC sharding); N <= 128 uses one full-size block. -------
    if tile_i is None or tile_j is None:
        if N <= 128:
            ti = tj = max(_round_up(N, 16), 16)
        else:
            ti, tj = 64, 128
        tile_i = tile_i if tile_i is not None else ti
        tile_j = tile_j if tile_j is not None else tj
    n_pad = _round_up(N, math.lcm(tile_i, tile_j))

    # ---- host-side glue: dense adjacency, in-degree, GCN-normalized adjacency -------
    src = edge_index[0].astype(jnp.int32)
    dst = edge_index[1].astype(jnp.int32)
    # adj[i, j] = 1 iff there is an edge j -> i (source_to_target flow).
    adj = jnp.zeros((N, N), jnp.float32).at[dst, src].set(1.0)
    deg = jnp.sum(adj, axis=1, keepdims=True)                      # in-degree per target
    a_hat = jnp.maximum(adj, jnp.eye(N, dtype=jnp.float32))        # + self loops (GCN)
    dh = jnp.sum(a_hat, axis=1)
    dinv = jnp.where(dh > 0, 1.0 / jnp.sqrt(dh), 0.0)
    gadj = dinv[:, None] * a_hat * dinv[None, :]

    row_pad = ((0, n_pad - N), (0, 0))
    sq_pad = ((0, n_pad - N), (0, n_pad - N))
    adj_f = jnp.pad(adj, sq_pad)
    adj_p = adj_f.astype(jnp.bfloat16)
    gadj_p = jnp.pad(gadj, sq_pad).astype(jnp.bfloat16)
    deg_p = jnp.pad(deg, row_pad)
    x_p = jnp.pad(x.astype(jnp.float32), row_pad)

    # per-(i,j)-block edge counts for empty-tile skipping (scalar prefetch -> SMEM)
    ni, nj = n_pad // tile_i, n_pad // tile_j
    cnt = adj_f.reshape(ni, tile_i, nj, tile_j).sum(axis=(1, 3))
    cnt = cnt.astype(jnp.int32).reshape(-1)                        # flat, row-major

    # ---- weight packing: fuse + lane-pad; bf16 for all MXU operands -----------------
    hid1_p = _round_up(2 * l1, 128)
    hid2_p = _round_up(2 * l2, 128)
    l1_p = _round_up(l1, 128)
    l2_p = _round_up(l2, 128)
    out2_p = _round_up(2 * out_channels, 128)

    w1_1, b1_1, w2_1, b2_1 = _pack_edge_layer(
        params["w1a_top"], params["w1a_bot"], params["b1a"],
        params["w1b"], params["b1b"], C, hid1_p, l1_p)
    w1_2, b1_2, w2_2, b2_2 = _pack_edge_layer(
        params["w2a_top"], params["w2a_bot"], params["b2a"],
        params["w2b"], params["b2b"], l1_p, hid2_p, l2_p)

    w_head = jnp.zeros((l2_p, out2_p), jnp.float32)
    w_head = w_head.at[:l2, :out_channels].set(params["w_mu"])
    w_head = w_head.at[:l2, out_channels:2 * out_channels].set(params["w_ls"])
    w_head = w_head.astype(jnp.bfloat16)
    b_head = jnp.zeros((1, out2_p), jnp.float32)
    b_head = b_head.at[:, :out_channels].set(params["b_mu"])
    b_head = b_head.at[:, out_channels:2 * out_channels].set(params["b_ls"])

    vmem_limit = _vmem_limit_bytes(tile_i, tile_j, max(hid1_p, hid2_p),
                                   max(l1_p, l2_p, out2_p))

    # layer 1: x -> h (bf16, lane-padded)
    h = _edgeconv_layer(cnt, x_p, adj_p, deg_p, w1_1, b1_1, w2_1, b2_1, None,
                        tile_i, tile_j, vmem_limit, jnp.bfloat16)
    # layer 2 + fused head projection: h -> hw = relu(EdgeConv2(h)) @ [W_mu | W_ls]
    hw = _edgeconv_layer(cnt, h, adj_p, deg_p, w1_2, b1_2, w2_2, b2_2, w_head,
                         tile_i, tile_j, vmem_limit, jnp.bfloat16)
    out = _gcn_head(gadj_p, hw, b_head, tile_i, vmem_limit)

    mu = out[:N, :out_channels]
    logstd = out[:N, out_channels:2 * out_channels]
    return mu, logstd


# ---------------------------------------------------------------------------
# Parameter init (matches the PyTorch module's layer sizing)
# ---------------------------------------------------------------------------
def init_params(key, in_channels, out_channels):
    l1 = in_channels - math.floor((in_channels - out_channels) / 3)
    l2 = in_channels - math.floor(2 * (in_channels - out_channels) / 3)

    def lin(k, fan_in, fan_out):
        kw, kb = jax.random.split(k)
        bound = 1.0 / math.sqrt(fan_in)
        w = jax.random.uniform(kw, (fan_in, fan_out), jnp.float32, -bound, bound)
        b = jax.random.uniform(kb, (1, fan_out), jnp.float32, -bound, bound)
        return w, b

    keys = jax.random.split(key, 6)
    w1a, b1a = lin(keys[0], 2 * in_channels, 2 * l1)
    w1b, b1b = lin(keys[1], 2 * l1, l1)
    w2a, b2a = lin(keys[2], 2 * l1, 2 * l2)
    w2b, b2b = lin(keys[3], 2 * l2, l2)
    wmu, bmu = lin(keys[4], l2, out_channels)
    wls, bls = lin(keys[5], l2, out_channels)
    return dict(
        w1a_top=w1a[:in_channels], w1a_bot=w1a[in_channels:], b1a=b1a,
        w1b=w1b, b1b=b1b,
        w2a_top=w2a[:l1], w2a_bot=w2a[l1:], b2a=b2a,
        w2b=w2b, b2b=b2b,
        w_mu=wmu, b_mu=bmu, w_ls=wls, b_ls=bls)


# ---------------------------------------------------------------------------
# Pure-JAX reference (same math, mirroring the kernel's bf16 casts exactly)
# ---------------------------------------------------------------------------
def reference_forward(x, edge_index, params):
    N = x.shape[0]
    bf = jnp.bfloat16
    src, dst = edge_index[0], edge_index[1]
    adj = jnp.zeros((N, N), jnp.float32).at[dst, src].set(1.0)
    deg = jnp.sum(adj, axis=1, keepdims=True)
    a_hat = jnp.maximum(adj, jnp.eye(N, dtype=jnp.float32))
    dh = jnp.sum(a_hat, axis=1)
    dinv = jnp.where(dh > 0, 1.0 / jnp.sqrt(dh), 0.0)
    gadj = (dinv[:, None] * a_hat * dinv[None, :]).astype(bf)

    def edge_conv(h, w_top, w_bot, b_a, w_b, b_b):
        hb = h.astype(bf)
        p = jnp.dot(hb, w_top.astype(bf), preferred_element_type=jnp.float32)
        q = jnp.dot(hb, w_bot.astype(bf), preferred_element_type=jnp.float32)
        base = (p - q + b_a).astype(bf)
        h1 = jnp.maximum(base[:, None, :] + q.astype(bf)[None, :, :], 0)
        msgs = jnp.dot(h1.reshape(N * N, -1), w_b.astype(bf),
                       preferred_element_type=jnp.float32).reshape(N, N, -1)
        masked = jnp.where(adj[:, :, None] > 0.5, msgs, -1e30)
        agg = jnp.max(masked, axis=1)
        agg = jnp.where(deg > 0.5, agg + b_b, 0.0)
        return jnp.maximum(agg, 0.0)

    h = edge_conv(x.astype(jnp.float32), params["w1a_top"], params["w1a_bot"],
                  params["b1a"], params["w1b"], params["b1b"])
    h = edge_conv(h, params["w2a_top"], params["w2a_bot"],
                  params["b2a"], params["w2b"], params["b2b"])

    def gcn(w, b):
        hw = jnp.dot(h.astype(bf), w.astype(bf), preferred_element_type=jnp.float32)
        return jnp.dot(gadj, hw.astype(bf), preferred_element_type=jnp.float32) + b

    return gcn(params["w_mu"], params["b_mu"]), gcn(params["w_ls"], params["b_ls"])


if __name__ == "__main__":
    key = jax.random.PRNGKey(0)
    kx, kp = jax.random.split(key)

    N, in_channels, out_channels = 16, 16, 4
    x = jax.random.normal(kx, (N, in_channels), jnp.float32)

    # small deterministic graph: bidirectional ring over N nodes -> E = 2N edges
    idx = jnp.arange(N)
    src = jnp.concatenate([idx, (idx + 1) % N])
    dst = jnp.concatenate([(idx + 1) % N, idx])
    edge_index = jnp.stack([src, dst]).astype(jnp.int32)     # (2, 2N)

    params = init_params(kp, in_channels, out_channels)

    mu, logstd = vpfae_edge_forward(x, edge_index, params)
    jax.block_until_ready((mu, logstd))

    mu_ref, ls_ref = reference_forward(x, edge_index, params)
    assert mu.shape == (N, out_channels) and logstd.shape == (N, out_channels)
    assert jnp.allclose(mu, mu_ref, atol=5e-3, rtol=5e-3), \
        float(jnp.max(jnp.abs(mu - mu_ref)))
    assert jnp.allclose(logstd, ls_ref, atol=5e-3, rtol=5e-3), \
        float(jnp.max(jnp.abs(logstd - ls_ref)))

    print("KERNEL_OK")
</pallas_src>

<mosaic_0001>
module attributes {stable_mosaic.version = 11 : i64} {
  func.func @kernel(%arg0: i32, %arg1: i32, %arg2: memref<1xi32, #tpu.memory_space<smem>>, %arg3: memref<16x16xf32, #tpu.memory_space<vmem>>, %arg4: memref<16x16xf32, #tpu.memory_space<vmem>>, %arg5: memref<16x16xbf16, #tpu.memory_space<vmem>>, %arg6: memref<16x1xf32, #tpu.memory_space<vmem>>, %arg7: memref<16x256xbf16, #tpu.memory_space<vmem>>, %arg8: memref<1x128xf32, #tpu.memory_space<vmem>>, %arg9: memref<128x128xbf16, #tpu.memory_space<vmem>>, %arg10: memref<1x128xf32, #tpu.memory_space<vmem>>, %arg11: memref<16x128xbf16, #tpu.memory_space<vmem>>, %arg12: memref<16x128xf32, #tpu.memory_space<vmem>>, %arg13: memref<16x128xf32, #tpu.memory_space<vmem>>) attributes {dimension_semantics = [#tpu.dimension_semantics<parallel>, #tpu.dimension_semantics<arbitrary>], iteration_bounds = array<i64: 1, 1>, scalar_prefetch = 1 : i64, scratch_operands = 2 : i64, tpu.core_type = #tpu.core_type<tc>, window_params = [{transform_indices = @transform_0, window_bounds = array<i64: 16, 16>}, {transform_indices = @transform_1, window_bounds = array<i64: 16, 16>}, {transform_indices = @transform_2, window_bounds = array<i64: 16, 16>}, {transform_indices = @transform_3, window_bounds = array<i64: 16, 1>}, {pipeline_mode = #tpu.pipeline_mode<synchronous>, transform_indices = @transform_4, window_bounds = array<i64: 16, 256>}, {pipeline_mode = #tpu.pipeline_mode<synchronous>, transform_indices = @transform_5, window_bounds = array<i64: 1, 128>}, {pipeline_mode = #tpu.pipeline_mode<synchronous>, transform_indices = @transform_6, window_bounds = array<i64: 128, 128>}, {pipeline_mode = #tpu.pipeline_mode<synchronous>, transform_indices = @transform_7, window_bounds = array<i64: 1, 128>}, {transform_indices = @transform_8, window_bounds = array<i64: 16, 128>}]} {
    %c0_i32 = arith.constant 0 : i32
    %0 = arith.cmpi eq, %arg1, %c0_i32 : i32
    %1 = arith.extui %0 : i1 to i32
    %c0_i32_0 = arith.constant 0 : i32
    %2 = arith.cmpi ne, %1, %c0_i32_0 : i32
    scf.if %2 {
      %c0 = arith.constant 0 : index
      %c0_5 = arith.constant 0 : index
      %13 = vector.load %arg3[%c0, %c0_5] : memref<16x16xf32, #tpu.memory_space<vmem>>, vector<16x16xf32>
      %14 = arith.truncf %13 : vector<16x16xf32> to vector<16x16xbf16>
      %c0_6 = arith.constant 0 : index
      %c0_7 = arith.constant 0 : index
      %15 = vector.load %arg7[%c0_6, %c0_7] : memref<16x256xbf16, #tpu.memory_space<vmem>>, vector<16x256xbf16>
      %cst = arith.constant dense<0.000000e+00> : vector<16x256xf32>
      %16 = tpu.matmul %14, %15, %cst {dimension_numbers = #tpu.dot_dimension_numbers<[1], [0], [0], [1], [0, 0, 1, 1], [], []>} : vector<16x16xbf16>, vector<16x256xbf16>, vector<16x256xf32> -> vector<16x256xf32>
      %17 = vector.extract_strided_slice %16 {offsets = [0, 0], sizes = [16, 128], strides = [1, 1]} : vector<16x256xf32> to vector<16x128xf32>
      %18 = vector.extract_strided_slice %16 {offsets = [0, 128], sizes = [16, 128], strides = [1, 1]} : vector<16x256xf32> to vector<16x128xf32>
      %19 = arith.subf %17, %18 : vector<16x128xf32>
      %c0_8 = arith.constant 0 : index
      %c0_9 = arith.constant 0 : index
      %20 = vector.load %arg8[%c0_8, %c0_9] : memref<1x128xf32, #tpu.memory_space<vmem>>, vector<1x128xf32>
      %21 = vector.broadcast %20 : vector<1x128xf32> to vector<16x128xf32>
      %22 = arith.addf %19, %21 : vector<16x128xf32>
      %c0_10 = arith.constant 0 : index
      %c0_11 = arith.constant 0 : index
      %23 = vector.load %arg13[%c0_10, %c0_11] : memref<16x128xf32, #tpu.memory_space<vmem>>, vector<16x128xf32>
      tpu.vector_store %arg13[%c0_10, %c0_11], %22 {strides = array<i32>} : memref<16x128xf32, #tpu.memory_space<vmem>>, vector<16x128xf32>,
      %cst_12 = arith.constant -1.000000e+30 : f32
      %24 = vector.broadcast %cst_12 : f32 to vector<16x128xf32>
      %c0_13 = arith.constant 0 : index
      %c0_14 = arith.constant 0 : index
      %25 = vector.load %arg12[%c0_13, %c0_14] : memref<16x128xf32, #tpu.memory_space<vmem>>, vector<16x128xf32>
      tpu.vector_store %arg12[%c0_13, %c0_14], %24 {strides = array<i32>} : memref<16x128xf32, #tpu.memory_space<vmem>>, vector<16x128xf32>,
    } else {
    }
    %c1_i32 = arith.constant 1 : i32
    %3 = arith.muli %arg0, %c1_i32 : i32
    %4 = arith.addi %3, %arg1 : i32
    %5 = arith.index_cast %4 : i32 to index
    %6 = memref.load %arg2[%5] : memref<1xi32, #tpu.memory_space<smem>>
    %c0_i32_1 = arith.constant 0 : i32
    %7 = arith.cmpi sgt, %6, %c0_i32_1 : i32
    %8 = arith.extui %7 : i1 to i32
    %c0_i32_2 = arith.constant 0 : i32
    %9 = arith.cmpi ne, %8, %c0_i32_2 : i32
    scf.if %9 {
      %c0 = arith.constant 0 : index
      %c0_5 = arith.constant 0 : index
      %13 = vector.load %arg4[%c0, %c0_5] : memref<16x16xf32, #tpu.memory_space<vmem>>, vector<16x16xf32>
      %14 = arith.truncf %13 : vector<16x16xf32> to vector<16x16xbf16>
      %c0_6 = arith.constant 0 : index
      %c128 = arith.constant 128 : index
      %15 = vector.load %arg7[%c0_6, %c128] : memref<16x256xbf16, #tpu.memory_space<vmem>>, vector<16x128xbf16>
      %cst = arith.constant dense<0.000000e+00> : vector<16x128xf32>
      %16 = tpu.matmul %14, %15, %cst {dimension_numbers = #tpu.dot_dimension_numbers<[1], [0], [0], [1], [0, 0, 1, 1], [], []>} : vector<16x16xbf16>, vector<16x128xbf16>, vector<16x128xf32> -> vector<16x128xf32>
      %c0_7 = arith.constant 0 : index
      %c0_8 = arith.constant 0 : index
      %17 = vector.load %arg13[%c0_7, %c0_8] : memref<16x128xf32, #tpu.memory_space<vmem>>, vector<16x128xf32>
      %18 = arith.truncf %17 : vector<16x128xf32> to vector<16x128xbf16>
      %19 = vector.shape_cast %18 : vector<16x128xbf16> to vector<16x1x128xbf16>
      %20 = arith.truncf %16 : vector<16x128xf32> to vector<16x128xbf16>
      %21 = vector.shape_cast %20 : vector<16x128xbf16> to vector<1x16x128xbf16>
      %22 = vector.broadcast %19 : vector<16x1x128xbf16> to vector<16x16x128xbf16>
      %23 = vector.broadcast %21 : vector<1x16x128xbf16> to vector<16x16x128xbf16>
      %24 = arith.addf %22, %23 : vector<16x16x128xbf16>
      %cst_9 = arith.constant 0.000000e+00 : bf16
      %25 = vector.broadcast %cst_9 : bf16 to vector<16x16x128xbf16>
      %26 = arith.maximumf %24, %25 : vector<16x16x128xbf16>
      %27 = vector.shape_cast %26 : vector<16x16x128xbf16> to vector<256x128xbf16>
      %c0_10 = arith.constant 0 : index
      %c0_11 = arith.constant 0 : index
      %28 = vector.load %arg9[%c0_10, %c0_11] : memref<128x128xbf16, #tpu.memory_space<vmem>>, vector<128x128xbf16>
      %cst_12 = arith.constant dense<0.000000e+00> : vector<256x128xf32>
      %29 = tpu.matmul %27, %28, %cst_12 {dimension_numbers = #tpu.dot_dimension_numbers<[1], [0], [0], [1], [0, 0, 1, 1], [], []>} : vector<256x128xbf16>, vector<128x128xbf16>, vector<256x128xf32> -> vector<256x128xf32>
      %30 = vector.shape_cast %29 : vector<256x128xf32> to vector<16x16x128xf32>
      %c0_13 = arith.constant 0 : index
      %c0_14 = arith.constant 0 : index
      %31 = vector.load %arg5[%c0_13, %c0_14] : memref<16x16xbf16, #tpu.memory_space<vmem>>, vector<16x16xbf16>
      %32 = vector.shape_cast %31 : vector<16x16xbf16> to vector<16x16x1xbf16>
      %cst_15 = arith.constant 5.000000e-01 : bf16
      %33 = vector.broadcast %cst_15 : bf16 to vector<16x16x1xbf16>
      %34 = arith.cmpf ogt, %32, %33 : vector<16x16x1xbf16>
      %cst_16 = arith.constant -1.000000e+30 : f32
      %35 = vector.shape_cast %34 : vector<16x16x1xi1> to vector<16x16x1xi1>
      %36 = vector.broadcast %35 : vector<16x16x1xi1> to vector<16x16x128xi1>
      %37 = vector.broadcast %cst_16 : f32 to vector<16x16x128xf32>
      %38 = arith.select %36, %30, %37 : vector<16x16x128xi1>, vector<16x16x128xf32>
      %c0_17 = arith.constant 0 : index
      %c0_18 = arith.constant 0 : index
      %39 = vector.load %arg12[%c0_17, %c0_18] : memref<16x128xf32, #tpu.memory_space<vmem>>, vector<16x128xf32>
      %cst_19 = arith.constant dense<0xFF800000> : vector<16x128xf32>
      %40 = vector.multi_reduction <maximumf>, %38, %cst_19 [1] : vector<16x16x128xf32> to vector<16x128xf32>
      %41 = arith.maximumf %39, %40 : vector<16x128xf32>
      %c0_20 = arith.constant 0 : index
      %c0_21 = arith.constant 0 : index
      %42 = vector.load %arg12[%c0_20, %c0_21] : memref<16x128xf32, #tpu.memory_space<vmem>>, vector<16x128xf32>
      tpu.vector_store %arg12[%c0_20, %c0_21], %41 {strides = array<i32>} : memref<16x128xf32, #tpu.memory_space<vmem>>, vector<16x128xf32>,
    } else {
    }
    %c0_i32_3 = arith.constant 0 : i32
    %10 = arith.cmpi eq, %arg1, %c0_i32_3 : i32
    %11 = arith.extui %10 : i1 to i32
    %c0_i32_4 = arith.constant 0 : i32
    %12 = arith.cmpi ne, %11, %c0_i32_4 : i32
    scf.if %12 {
      %c0 = arith.constant 0 : index
      %c0_5 = arith.constant 0 : index
      %13 = vector.load %arg6[%c0, %c0_5] : memref<16x1xf32, #tpu.memory_space<vmem>>, vector<16x1xf32>
      %cst = arith.constant 5.000000e-01 : f32
      %14 = vector.broadcast %cst : f32 to vector<16x1xf32>
      %15 = arith.cmpf ogt, %13, %14 : vector<16x1xf32>
      %c0_6 = arith.constant 0 : index
      %c0_7 = arith.constant 0 : index
      %16 = vector.load %arg12[%c0_6, %c0_7] : memref<16x128xf32, #tpu.memory_space<vmem>>, vector<16x128xf32>
      %c0_8 = arith.constant 0 : index
      %c0_9 = arith.constant 0 : index
      %17 = vector.load %arg10[%c0_8, %c0_9] : memref<1x128xf32, #tpu.memory_space<vmem>>, vector<1x128xf32>
      %18 = vector.broadcast %17 : vector<1x128xf32> to vector<16x128xf32>
      %19 = arith.addf %16, %18 : vector<16x128xf32>
      %cst_10 = arith.constant 0.000000e+00 : f32
      %20 = vector.shape_cast %15 : vector<16x1xi1> to vector<16x1xi1>
      %21 = vector.broadcast %20 : vector<16x1xi1> to vector<16x128xi1>
      %22 = vector.broadcast %cst_10 : f32 to vector<16x128xf32>
      %23 = arith.select %21, %19, %22 : vector<16x128xi1>, vector<16x128xf32>
      %cst_11 = arith.constant 0.000000e+00 : f32
      %24 = vector.broadcast %cst_11 : f32 to vector<16x128xf32>
      %25 = arith.maximumf %23, %24 : vector<16x128xf32>
      %26 = arith.truncf %25 : vector<16x128xf32> to vector<16x128xbf16>
      %c0_12 = arith.constant 0 : index
      %c0_13 = arith.constant 0 : index
      %27 = vector.load %arg11[%c0_12, %c0_13] : memref<16x128xbf16, #tpu.memory_space<vmem>>, vector<16x128xbf16>
      tpu.vector_store %arg11[%c0_12, %c0_13], %26 {strides = array<i32>} : memref<16x128xbf16, #tpu.memory_space<vmem>>, vector<16x128xbf16>,
    } else {
    }
    return
  }
  func.func @transform_0(%arg0: i32, %arg1: i32, %arg2: memref<1xi32, #tpu.memory_space<smem>>) -> (i32, i32) {
    %c0_i32 = arith.constant 0 : i32
    %c0_i32_0 = arith.constant 0 : i32
    return %arg0, %c0_i32 : i32, i32
  }
  func.func @transform_1(%arg0: i32, %arg1: i32, %arg2: memref<1xi32, #tpu.memory_space<smem>>) -> (i32, i32) {
    %c0_i32 = arith.constant 0 : i32
    %c0_i32_0 = arith.constant 0 : i32
    return %arg1, %c0_i32 : i32, i32
  }
  func.func @transform_2(%arg0: i32, %arg1: i32, %arg2: memref<1xi32, #tpu.memory_space<smem>>) -> (i32, i32) {
    %c0_i32 = arith.constant 0 : i32
    return %arg0, %arg1 : i32, i32
  }
  func.func @transform_3(%arg0: i32, %arg1: i32, %arg2: memref<1xi32, #tpu.memory_space<smem>>) -> (i32, i32) {
    %c0_i32 = arith.constant 0 : i32
    %c0_i32_0 = arith.constant 0 : i32
    return %arg0, %c0_i32 : i32, i32
  }
  func.func @transform_4(%arg0: i32, %arg1: i32, %arg2: memref<1xi32, #tpu.memory_space<smem>>) -> (i32, i32) {
    %c0_i32 = arith.constant 0 : i32
    %c0_i32_0 = arith.constant 0 : i32
    %c0_i32_1 = arith.constant 0 : i32
    return %c0_i32, %c0_i32_0 : i32, i32
  }
  func.func @transform_5(%arg0: i32, %arg1: i32, %arg2: memref<1xi32, #tpu.memory_space<smem>>) -> (i32, i32) {
    %c0_i32 = arith.constant 0 : i32
    %c0_i32_0 = arith.constant 0 : i32
    %c0_i32_1 = arith.constant 0 : i32
    return %c0_i32, %c0_i32_0 : i32, i32
  }
  func.func @transform_6(%arg0: i32, %arg1: i32, %arg2: memref<1xi32, #tpu.memory_space<smem>>) -> (i32, i32) {
    %c0_i32 = arith.constant 0 : i32
    %c0_i32_0 = arith.constant 0 : i32
    %c0_i32_1 = arith.constant 0 : i32
    return %c0_i32, %c0_i32_0 : i32, i32
  }
  func.func @transform_7(%arg0: i32, %arg1: i32, %arg2: memref<1xi32, #tpu.memory_space<smem>>) -> (i32, i32) {
    %c0_i32 = arith.constant 0 : i32
    %c0_i32_0 = arith.constant 0 : i32
    %c0_i32_1 = arith.constant 0 : i32
    return %c0_i32, %c0_i32_0 : i32, i32
  }
  func.func @transform_8(%arg0: i32, %arg1: i32, %arg2: memref<1xi32, #tpu.memory_space<smem>>) -> (i32, i32) {
    %c0_i32 = arith.constant 0 : i32
    %c0_i32_0 = arith.constant 0 : i32
    return %arg0, %c0_i32 : i32, i32
  }
}

</mosaic_0001>

<bundles_post_ra>
// kernel: tpu_custom_call.1
= control target key start
LH: loop header
LB: loop body
LE: loop exit
PB: predicated region body
PF: predicated region fallthrough
CT: control target
= control target key end

     0   :  { %15 = vsyncpa [#allocation7], 0  ;;  %s2547_s0 = inlined_call_operand.<no memory space> [shape: s32[1], index: 0, kind: input, shape index: {}]   ;;  %s2548_s1 = inlined_call_operand.vmem [shape: f32[16,16], index: 1, kind: input, shape index: {}]   ;;  %s2549_s2 = inlined_call_operand.hbm [shape: f32[16,16], index: 2, kind: input, shape index: {}]   ;;  %s2550_s3 = inlined_call_operand.hbm [shape: bf16[16,16], index: 3, kind: input, shape index: {}]   ;;  %s2551_s4 = inlined_call_operand.vmem [shape: f32[16,1], index: 4, kind: input, shape index: {}]   ;;  %s2552_s5 = inlined_call_operand.vmem [shape: bf16[16,256], index: 5, kind: input, shape index: {}]   ;;  %s2553_s6 = inlined_call_operand.vmem [shape: f32[1,128], index: 6, kind: input, shape index: {}]   ;;  %s2554_s7 = inlined_call_operand.hbm [shape: bf16[128,128], index: 7, kind: input, shape index: {}]   ;;  %s2555_s8 = inlined_call_operand.vmem [shape: f32[1,128], index: 8, kind: input, shape index: {}]   ;;  %s2556_s9 = inlined_call_operand.hbm [shape: bf16[16,128], index: 9, kind: output, shape index: {}]  }
   0x1   :  { %16 = vsyncpa [#allocation10], 0 }
   0x2   :  { %17 = vsyncpa [#allocation8], 0  ;;  %s1914_s30 = smov [#allocation9]   ;;  %s1820_s13 = scalar_lea.hbm %s2550_s3, 128 }
   0x3   :  { %s37_s10 = sshll.u32 %s1914_s30, 4  ;;  %p1821_p0 = scmp.ne.s32.totalorder %s2550_s3, %s1820_s13  ;;  %s38_s10 = int_to_ptr.vmem [resolvable:$true] %s37_s10 }
   0x4   :  { %p1824_p1 = scmp.lt.u32.totalorder %s1820_s13, %s2550_s3 }
   0x6   :  { %p1826_p2 = pnand %p1824_p1, %p1821_p0 }
   0x8   :  { %1829 = shalt.err (!%p1826_p2)
}
   0x9   :  { %s1830_s18 = scalar_lea.vmem %s38_s10, 128  ;;  %p1835_p4 = scmp.lt.s32.totalorder %s38_s10, %s38_s10 }
   0xa   :  { %p1831_p3 = scmp.ne.s32.totalorder %s38_s10, %s1830_s18  ;;  %p1836_p5 = scmp.lt.s32.totalorder %s1830_s18, %s1830_s18 }
   0xc   :  { %p1837_p6 = por %p1836_p5, %p1835_p4 }
   0xe   :  { %p1838_p7 = pnand %p1837_p6, %p1831_p3 }
  0x10   :  { %1841 = shalt.err (!%p1838_p7)
}
  0x11   :  { %s1915_s19 = smov 64   ;;  %s1916_s20 = smov 4  }
  0x12   :  { %43 = dma.hbm_to_vmem [thread:$0]  %s2550_s3, 128, %s38_s10, [#allocation10], %s1915_s19, %s1915_s19, %s1916_s20  }
  0x13   :  { %s1917_s23 = smov [#allocation6]   ;;  %s1842_s27 = scalar_lea.hbm %s2549_s2, 256 }
  0x14   :  { %s25_s24 = sshll.u32 %s1917_s23, 4  ;;  %p1843_p8 = scmp.ne.s32.totalorder %s2549_s2, %s1842_s27  ;;  %s26_s24 = int_to_ptr.vmem [resolvable:$true] %s25_s24 }
  0x15   :  { %p1846_p9 = scmp.lt.u32.totalorder %s1842_s27, %s2549_s2 }
  0x17   :  { %p1848_p10 = pnand %p1846_p9, %p1843_p8 }
  0x19   :  { %1851 = shalt.err (!%p1848_p10)
}
  0x1a   :  { %s1852_s12 = scalar_lea.vmem %s26_s24, 256  ;;  %p1857_p12 = scmp.lt.s32.totalorder %s26_s24, %s26_s24 }
  0x1b   :  { %p1853_p11 = scmp.ne.s32.totalorder %s26_s24, %s1852_s12  ;;  %p1858_p13 = scmp.lt.s32.totalorder %s1852_s12, %s1852_s12 }
  0x1d   :  { %p1859_p0 = por %p1858_p13, %p1857_p12 }
  0x1f   :  { %p1860_p1 = pnand %p1859_p0, %p1853_p11 }
  0x21   :  { %1863 = shalt.err (!%p1860_p1)
}
  0x22   :  { %s1918_s3 = smov 128   ;;  %s1919_s10 = smov 8  }
  0x23   :  { %31 = dma.hbm_to_vmem [thread:$0]  %s2549_s2, 256, %s26_s24, [#allocation7], %s1918_s3, %s1918_s3, %s1919_s10  }
  0x24   :  { %s1920_s15 = smov [#allocation11]   ;;  %s1864_s21 = scalar_lea.hbm %s2554_s7, 1024 }
  0x25   :  { %s55_s16 = sshll.u32 %s1920_s15, 4  ;;  %p1865_p2 = scmp.ne.s32.totalorder %s2554_s7, %s1864_s21  ;;  %s56_s16 = int_to_ptr.vmem [resolvable:$true] %s55_s16 }
  0x26   :  { %p1868_p3 = scmp.lt.u32.totalorder %s1864_s21, %s2554_s7 }
  0x28   :  { %p1870_p4 = pnand %p1868_p3, %p1865_p2 }
  0x2a   :  { %1873 = shalt.err (!%p1870_p4)
}
  0x2b   :  { %s1874_s27 = scalar_lea.vmem %s56_s16, 1024  ;;  %p1879_p6 = scmp.lt.s32.totalorder %s56_s16, %s56_s16 }
  0x2c   :  { %p1875_p5 = scmp.ne.s32.totalorder %s56_s16, %s1874_s27  ;;  %p1880_p7 = scmp.lt.s32.totalorder %s1874_s27, %s1874_s27 }
  0x2e   :  { %p1881_p8 = por %p1880_p7, %p1879_p6 }
  0x30   :  { %p1882_p9 = pnand %p1881_p8, %p1875_p5 }
  0x32   :  { %1885 = shalt.err (!%p1882_p9)
}
  0x33   :  { %61 = dma.hbm_to_vmem [thread:$0]  %s2554_s7, 1024, %s56_s16, [#allocation10], %s1915_s19, %s1915_s19, %s1916_s20  }
  0x34   :  { %1908 = dma.done.wait [#allocation7], 256  }
  0x35   :  { %1909 = vsyncadd [#allocation7], 4294967040 }
  0x36   :  { %1910 = dma.done.wait [#allocation10], 1152  }
  0x37   :  { %1911 = vsyncadd [#allocation10], 4294966144  ;;  %v1921_v0 = vmov -1e+30   ;;  %v1922_v1 = vmov 0   ;;  %v81_v4 = vld [vmem:[%s2548_s1] sm:$0xff] }
  0x38   :  { %156 = vst [vmem:[#allocation2] sm:$0xff] %v1921_v0  ;;  %157 = vst [vmem:[#allocation2 + $0x8] sm:$0xff] %v1921_v0  ;;  %132 = vmatprep.mubr.bf16.mxu0 %v1922_v1  ;;  %v1804_v2 = vld [vmem:[%s2552_s5 + $0x4] ss:$8 sps:$4 sm:$0xff]   ;;  %v1806_v3 = vld [vmem:[%s2552_s5] ss:$8 sps:$4 sm:$0xff]  }
  0x39   :  { %v82_v5 = vld [vmem:[%s2548_s1 + $0x8] sm:$0xff]  ;;  %100 = vmatprep.subr.bf16.mxu0 %v1804_v2  ;;  %vm96_vm0 = vcmask 130048   ;;  %v1660_v9 = vld [vmem:[%s2553_s6] ss:$0 sm:$0xff]  ;;  %p1661_p10 = scmp.le.s32.totalorder %s2547_s0, 0 }
  0x3a   :  { %v83_v6 = vpack.c.bf16 %v82_v5, %v81_v4  ;;  %101 = vmatpush1.bf16.msra.mxu0 %v1806_v3  ;;  %v228_v16 = vlaneseq (!%p1661_p10)  ;;  %v1923_v17 = vmov (!%p1661_p10), 0.0   ;;  %v1809_v18 = vld [vmem:[%s2552_s5 + $0x4] ss:$8 sps:$4 sm:$0xff] (!%p1661_p10)   ;;  %vm1924_vm1 = vmmov (!%p1661_p10), 0   ;;  %v1810_v23 = vld [vmem:[#allocation9] sm:$0xff] (!%p1661_p10)   ;;  %v1811_v25 = vld [vmem:[#allocation11] sm:$0xff] (!%p1661_p10)  }
  0x3b   :  { %1718 = vmatprep.subr.bf16.mxu0 (!%p1661_p10), %v1923_v17  ;;  %v164_v19 = vld [vmem:[#allocation6] sm:$0xff] (!%p1661_p10)  ;;  %v165_v20 = vld [vmem:[#allocation6 + $0x8] sm:$0xff] (!%p1661_p10)  ;;  %v1925_v24 = vmov (!%p1661_p10), 0   ;;  %v2052_v27 = vpack.i.b16 (!%p1661_p10), %v1810_v23, %v1810_v23  ;;  %v756_v29 = vshrl.u32 (!%p1661_p10), %v1810_v23, 16  ;;  %1772 = vmatprep.subr.bf16.mxu1 (!%p1661_p10), %v1811_v25  ;;  %v1814_v40 = vld [vmem:[#allocation11 + $0x18] sm:$0xff] (!%p1661_p10)  }
  0x3c   :  { %v166_v21 = vpack.c.bf16 (!%p1661_p10), %v165_v20, %v164_v19  ;;  %v2045_v22 = vshrl.u32 (!%p1661_p10), %v228_v16, 7  ;;  %1808 = vset.pattern.permute.xlu1 (!%p1661_p10), %v1925_v24  ;;  %1807 = vset.pattern.permute.xlu0 (!%p1661_p10), %v1925_v24  ;;  %v1812_v32 = vld [vmem:[#allocation11 + $0x8] sm:$0xff] (!%p1661_p10)   ;;  %v1813_v37 = vld [vmem:[#allocation11 + $0x10] sm:$0xff] (!%p1661_p10)   ;;  %v1815_v44 = vld [vmem:[#allocation11 + $0x20] sm:$0xff] (!%p1661_p10)   ;;  %v1926_v60 = vmov (!%p1661_p10), 839922192  }
  0x3d   :  { %1659 = vmatmul.mubr.msk.bf16.vlgmr.msra.gmra.mrb[0].mxu0 %vm96_vm0, %v83_v6  ;;  %1780 = vmatpush3.bf16.msra.mxu1 (!%p1661_p10), %v1811_v25  ;;  %v757_v36 = vpack.i.b16 (!%p1661_p10), %v756_v29, %v756_v29  ;;  %v1816_v48 = vld [vmem:[#allocation11 + $0x28] sm:$0xff] (!%p1661_p10)   ;;  %v1817_v58 = vld [vmem:[#allocation11 + $0x30] sm:$0xff] (!%p1661_p10)   ;;  %v1818_v59 = vld [vmem:[#allocation11 + $0x38] sm:$0xff] (!%p1661_p10)   ;;  %v897_v61 = vunpack.c.l.s4 (!%p1661_p10), %v1926_v60  ;;  %v1927_v62 = vmov (!%p1661_p10), 1985246804  }
  0x3e   :  { %1720 = vmatprep.mubr.msk.bf16.mxu0 (!%p1661_p10), %vm1924_vm1, %v1923_v17  ;;  %1719 = vmatpush3.bf16.msra.mxu0 (!%p1661_p10), %v1809_v18  ;;  %v2050_v26 = vsub.s32 (!%p1661_p10), 0, %v2045_v22  ;;  %v768_v28 = vsub.s32 (!%p1661_p10), 1, %v2045_v22  ;;  %v810_v30 = vsub.s32 (!%p1661_p10), 4, %v2045_v22  ;;  %v824_v31 = vsub.s32 (!%p1661_p10), 5, %v2045_v22 }
  0x3f   :  { %1724 = vmatprep.subr.bf16.mxu0 (!%p1661_p10), %v1811_v25  ;;  %1773 = vmatprep.subr.bf16.mxu1 (!%p1661_p10), %v1812_v32  ;;  %v782_v43 = vsub.s32 (!%p1661_p10), 2, %v2045_v22  ;;  %v838_v46 = vsub.s32 (!%p1661_p10), 6, %v2045_v22  ;;  %v796_v51 = vsub.s32 (!%p1661_p10), 3, %v2045_v22  ;;  %v852_v53 = vsub.s32 (!%p1661_p10), 7, %v2045_v22 }
  0x40   :  { %v752_v33 = vrot.slane (!%p1661_p10), %v2052_v27, %v2050_v26  ;;  %v811_v34 = vrot.slane (!%p1661_p10), %v2052_v27, %v810_v30  ;;  %v769_v35 = vrot.slane (!%p1661_p10), %v2052_v27, %v768_v28  ;;  %v825_v38 = vrot.slane (!%p1661_p10), %v2052_v27, %v824_v31 }
  0x41   :  { %1781 = vmatpush3.bf16.msra.mxu1 (!%p1661_p10), %v1812_v32  ;;  %v762_v39 = vrot.slane (!%p1661_p10), %v757_v36, %v2050_v26  ;;  %v818_v41 = vrot.slane (!%p1661_p10), %v757_v36, %v810_v30  ;;  %v776_v42 = vrot.slane (!%p1661_p10), %v757_v36, %v768_v28  ;;  %v832_v45 = vrot.slane (!%p1661_p10), %v757_v36, %v824_v31 }
  0x42   :  { %754 = vbcast.lane.c.b16.xlu0 (!%p1661_p10), %v752_v33, 256  ;;  %813 = vbcast.lane.c.b16.xlu1 (!%p1661_p10), %v811_v34, 256  ;;  %v783_v47 = vrot.slane (!%p1661_p10), %v2052_v27, %v782_v43  ;;  %v839_v49 = vrot.slane (!%p1661_p10), %v2052_v27, %v838_v46  ;;  %v790_v50 = vrot.slane (!%p1661_p10), %v757_v36, %v782_v43  ;;  %v904_v63 = vunpack.c.l.s4 (!%p1661_p10), %v1927_v62 }
  0x43   :  { %1774 = vmatprep.subr.bf16.mxu1 (!%p1661_p10), %v1813_v37  ;;  %v846_v52 = vrot.slane (!%p1661_p10), %v757_v36, %v838_v46  ;;  %v797_v54 = vrot.slane (!%p1661_p10), %v2052_v27, %v796_v51  ;;  %v853_v55 = vrot.slane (!%p1661_p10), %v2052_v27, %v852_v53  ;;  %v804_v56 = vrot.slane (!%p1661_p10), %v757_v36, %v796_v51 }
  0x44   :  { %v860_v57 = vrot.slane (!%p1661_p10), %v757_v36, %v852_v53  ;;  %v898_v0 = vunpack.c.0.s8 (!%p1661_p10), %v897_v61  ;;  %v905_v2 = vunpack.c.0.s8 (!%p1661_p10), %v904_v63 }
  0x45   :  { %1782 = vmatpush3.bf16.msra.mxu1 (!%p1661_p10), %v1813_v37 }
  0x46   :  { %771 = vbcast.lane.c.b16.xlu0 (!%p1661_p10), %v769_v35, 256  ;;  %827 = vbcast.lane.c.b16.xlu1 (!%p1661_p10), %v825_v38, 256  ;;  %v2073_v3 = vsub.s32 (!%p1661_p10), %v898_v0, %v2045_v22  ;;  %v2076_v4 = vsub.s32 (!%p1661_p10), %v905_v2, %v2045_v22 }
  0x47   :  { %1775 = vmatprep.subr.bf16.mxu1 (!%p1661_p10), %v1814_v40 }
  0x49   :  { %1783 = vmatpush3.bf16.msra.mxu1 (!%p1661_p10), %v1814_v40 }
  0x4a   :  { %764 = vbcast.lane.c.b16.xlu0 (!%p1661_p10), %v762_v39, 256  ;;  %820 = vbcast.lane.c.b16.xlu1 (!%p1661_p10), %v818_v41, 256 }
  0x4b   :  { %1776 = vmatprep.subr.bf16.mxu1 (!%p1661_p10), %v1815_v44 }
  0x4d   :  { %1784 = vmatpush3.bf16.msra.mxu1 (!%p1661_p10), %v1815_v44 }
  0x4e   :  { %778 = vbcast.lane.c.b16.xlu0 (!%p1661_p10), %v776_v42, 256  ;;  %834 = vbcast.lane.c.b16.xlu1 (!%p1661_p10), %v832_v45, 256 }
  0x4f   :  { %1777 = vmatprep.subr.bf16.mxu1 (!%p1661_p10), %v1816_v48 }
  0x51   :  { %1785 = vmatpush3.bf16.msra.mxu1 (!%p1661_p10), %v1816_v48 }
  0x52   :  { %785 = vbcast.lane.c.b16.xlu0 (!%p1661_p10), %v783_v47, 256  ;;  %841 = vbcast.lane.c.b16.xlu1 (!%p1661_p10), %v839_v49, 256 }
  0x53   :  { %1778 = vmatprep.subr.bf16.mxu1 (!%p1661_p10), %v1817_v58 }
  0x55   :  { %1786 = vmatpush3.bf16.msra.mxu1 (!%p1661_p10), %v1817_v58 }
  0x56   :  { %792 = vbcast.lane.c.b16.xlu0 (!%p1661_p10), %v790_v50, 256  ;;  %848 = vbcast.lane.c.b16.xlu1 (!%p1661_p10), %v846_v52, 256 }
  0x57   :  { %1779 = vmatprep.subr.bf16.mxu1 (!%p1661_p10), %v1818_v59 }
  0x59   :  { %1787 = vmatpush3.bf16.msra.mxu1 (!%p1661_p10), %v1818_v59 }
  0x5a   :  { %799 = vbcast.lane.c.b16.xlu0 (!%p1661_p10), %v797_v54, 256  ;;  %855 = vbcast.lane.c.b16.xlu1 (!%p1661_p10), %v853_v55, 256 }
  0x5e   :  { %806 = vbcast.lane.c.b16.xlu0 (!%p1661_p10), %v804_v56, 256  ;;  %862 = vbcast.lane.c.b16.xlu1 (!%p1661_p10), %v860_v57, 256 }
  0xb4   :  { %v755_v5 = vpop.permute.xlu0 (!%p1661_p10), %754  ;;  %v814_v6 = vpop.permute.xlu1 (!%p1661_p10), %813 }
  0xb5   :  { %vm864_vm2 = vcmp.gt.bf16.partialorder (!%p1661_p10), %v755_v5, 1056980736  ;;  %vm872_vm6 = vcmp.gt.bf16.partialorder (!%p1661_p10), %v814_v6, 1056980736 }
 0x110   :  { %v134_v7 = vpop.f32.mrb[0].mxu0 }
 0x111   :  { %v136_v8 = vpop.f32.mrb[1].mxu0 }
 0x112   :  { %v143_v10 = vsub.f32 %v134_v7, %v136_v8  ;;  %v138_v11 = vpop.f32.mrb[2].mxu0  ;;  %163 = sbr.rel (%p1661_p10) target bundleno = 766 (0x2fe), region = 53  ;;  %v880_v7 = vsel (!%p1661_p10), %vm864_vm2, 65537, %v1925_v24 }
 0x113   :  { %v140_v12 = vpop.f32.mrb[3].mxu0  ;;  %1721 = vmatmul.mubr.msk.bf16.vlgmr.msra.gmra.mrb[0].mxu0 (!%p1661_p10), %vm96_vm0, %v166_v21  ;;  %v902_v8 = vrot.slane (!%p1661_p10), %v880_v7, %v2073_v3  ;;  %v888_v21 = vsel (!%p1661_p10), %vm872_vm6, 65537, %v1925_v24 }
 0x114   :  { %v152_v13 = vadd.f32 %v1660_v9, %v143_v10  ;;  %v144_v14 = vsub.f32 %v138_v11, %v140_v12  ;;  %1725 = vmatpush3.bf16.msra.mxu0 (!%p1661_p10), %v1811_v25  ;;  %v772_v10 = vpop.permute.xlu0 (!%p1661_p10), %771  ;;  %v828_v11 = vpop.permute.xlu1 (!%p1661_p10), %827  ;;  %v1021_v30 = vrot.slane (!%p1661_p10), %v888_v21, %v2076_v4 }
 0x115   :  { %1726 = vmatprep.subr.bf16.mxu0 (!%p1661_p10), %v1812_v32  ;;  %vm1120_vm3 = vcmp.ne.s16.totalorder (!%p1661_p10), %v902_v8, 0  ;;  %vm866_vm5 = vcmp.gt.bf16.partialorder (!%p1661_p10), %v772_v10, 1056980736  ;;  %vm874_vm10 = vcmp.gt.bf16.partialorder (!%p1661_p10), %v828_v11, 1056980736 }
 0x116   :  { %154 = vst [vmem:[#allocation3] sm:$0xff] %v152_v13  ;;  %v153_v15 = vadd.f32 %v1660_v9, %v144_v14  ;;  %v909_v9 = vrot.slane (!%p1661_p10), %v880_v7, %v2076_v4  ;;  %v882_v12 = vsel (!%p1661_p10), %vm866_vm5, 65537, %v1925_v24  ;;  %v1152_v18 = vsel (!%p1661_p10), %vm1120_vm3, 65537, %v1925_v24 }
 0x117   :  { %v930_v13 = vrot.slane (!%p1661_p10), %v882_v12, %v2073_v3  ;;  %v937_v14 = vrot.slane (!%p1661_p10), %v882_v12, %v2076_v4  ;;  %v1184_v19 = vunpack.c.l.b16 (!%p1661_p10), %v1152_v18  ;;  %v890_v33 = vsel (!%p1661_p10), %vm874_vm10, 65537, %v1925_v24 }
 0x118   :  { %155 = vst [vmem:[#allocation3 + $0x8] sm:$0xff] %v153_v15  ;;  %1727 = vmatpush3.bf16.msra.mxu0 (!%p1661_p10), %v1812_v32  ;;  %vm1121_vm4 = vcmp.ne.s16.totalorder (!%p1661_p10), %v909_v9, 0  ;;  %v765_v16 = vpop.permute.xlu0 (!%p1661_p10), %764  ;;  %v821_v20 = vpop.permute.xlu1 (!%p1661_p10), %820  ;;  %v1014_v32 = vrot.slane (!%p1661_p10), %v888_v21, %v2073_v3  ;;  %vm2096_vm14 = vcmp.ne.s16.totalorder (!%p1661_p10), %v1021_v30, 0  ;;  %v1042_v38 = vrot.slane (!%p1661_p10), %v890_v33, %v2073_v3 }
 0x119   :  { %1728 = vmatprep.subr.bf16.mxu0 %v1813_v37  ;;  %v1153_v15 = vsel %vm1121_vm4, 65537, %v1925_v24  ;;  %vm1124_vm7 = vcmp.ne.s16.totalorder %v930_v13, 0  ;;  %vm1125_vm8 = vcmp.ne.s16.totalorder %v937_v14, 0  ;;  %vm1216_vm11 = vcmp.ne.s32.totalorder %v1184_v19, 0 }
 0x11a   :  { %v1185_v17 = vunpack.c.l.b16 %v1153_v15  ;;  %v1248_v27 = vsel %vm1216_vm11, 1, %v1925_v24  ;;  %v1157_v28 = vsel %vm1125_vm8, 65537, %v1925_v24  ;;  %v1156_v29 = vsel %vm1124_vm7, 65537, %v1925_v24 }
 0x11b   :  { %1281 = vperm.xlu0 %1807, %v1248_v27   ;;  %v1189_v34 = vunpack.c.l.b16 %v1157_v28  ;;  %vm865_vm12 = vcmp.gt.bf16.partialorder %v765_v16, 1056980736  ;;  %v1188_v35 = vunpack.c.l.b16 %v1156_v29  ;;  %vm2103_vm0 = vcmp.ne.s16.totalorder %v1014_v32, 0 }
 0x11c   :  { %1729 = vmatpush3.bf16.msra.mxu0 %v1813_v37  ;;  %vm1217_vm9 = vcmp.ne.s32.totalorder %v1185_v17, 0  ;;  %v779_v25 = vpop.permute.xlu0 %778  ;;  %v2092_v31 = vpop.permute.xlu1 %834  ;;  %v881_v41 = vsel %vm865_vm12, 65537, %v1925_v24  ;;  %v1049_v47 = vrot.slane %v890_v33, %v2076_v4  ;;  %vm873_vm3 = vcmp.gt.bf16.partialorder %v821_v20, 1056980736 }
 0x11d   :  { %1730 = vmatprep.subr.bf16.mxu0 %v1814_v40  ;;  %v1249_v23 = vsel %vm1217_vm9, 1, %v1925_v24  ;;  %vm1221_vm13 = vcmp.ne.s32.totalorder %v1189_v34, 0  ;;  %vm1220_vm1 = vcmp.ne.s32.totalorder %v1188_v35, 0  ;;  %v1169_v50 = vsel %vm2096_vm14, 65537, %v1925_v24 }
 0x11e   :  { %1284 = vperm.xlu1 %1808, %v1249_v23   ;;  %v1253_v39 = vsel %vm1221_vm13, 1, %v1925_v24  ;;  %v1252_v46 = vsel %vm1220_vm1, 1, %v1925_v24  ;;  %vm867_vm4 = vcmp.gt.bf16.partialorder %v779_v25, 1056980736  ;;  %vm2118_vm5 = vcmp.ne.s16.totalorder %v1042_v38, 0 }
 0x11f   :  { %1296 = vperm.xlu0 %1807, %v1253_v39   ;;  %v923_v52 = vrot.slane %v881_v41, %v2076_v4  ;;  %v1201_v55 = vunpack.c.l.b16 %v1169_v50  ;;  %v2128_v57 = vsel %vm873_vm3, 65537, %v1925_v24  ;;  %v2132_v61 = vsel %vm867_vm4, 65537, %v1925_v24 }
 0x120   :  { %1731 = vmatpush3.bf16.msra.mxu0 %v1814_v40  ;;  %v786_v36 = vpop.permute.xlu0 %785  ;;  %v842_v40 = vpop.permute.xlu1 %841  ;;  %vm2134_vm8 = vcmp.ne.s16.totalorder %v1049_v47, 0  ;;  %v1168_v0 = vsel %vm2103_vm0, 65537, %v1925_v24  ;;  %v916_v5 = vrot.slane %v881_v41, %v2073_v3  ;;  %v1028_v6 = vrot.slane %v2128_v57, %v2073_v3 }
 0x121   :  { %1732 = vmatprep.subr.bf16.mxu0 %v1815_v44  ;;  %vm868_vm15 = vcmp.gt.bf16.partialorder %v786_v36, 1056980736  ;;  %vm876_vm2 = vcmp.gt.bf16.partialorder %v842_v40, 1056980736  ;;  %vm1233_vm11 = vcmp.ne.s32.totalorder %v1201_v55, 0  ;;  %v1200_v9 = vunpack.c.l.b16 %v1168_v0 }
 0x122   :  { %v884_v43 = vsel %vm868_vm15, 65537, %v1925_v24  ;;  %1293 = vperm.xlu1 %1808, %v1252_v46   ;;  %vm2147_vm12 = vcmp.ne.s16.totalorder %v923_v52, 0  ;;  %v944_v11 = vrot.slane %v2132_v61, %v2073_v3  ;;  %v1035_v12 = vrot.slane %v2128_v57, %v2076_v4 }
 0x123   :  { %v965_v45 = vrot.slane %v884_v43, %v2076_v4  ;;  %v1265_v15 = vsel %vm1233_vm11, 1, %v1925_v24  ;;  %vm1232_vm0 = vcmp.ne.s32.totalorder %v1200_v9, 0  ;;  %vm2165_vm1 = vcmp.ne.s16.totalorder %v916_v5, 0 }
 0x124   :  { %1733 = vmatpush3.bf16.msra.mxu0 %v1815_v44  ;;  %v958_v44 = vrot.slane %v884_v43, %v2073_v3  ;;  %v2113_v49 = vpop.permute.xlu0 %792  ;;  %v2125_v56 = vpop.permute.xlu1 %848  ;;  %v1264_v19 = vsel %vm1232_vm0, 1, %v1925_v24  ;;  %v1173_v23 = vsel %vm2134_vm8, 65537, %v1925_v24  ;;  %v951_v25 = vrot.slane %v2132_v61, %v2076_v4 }
 0x125   :  { %1734 = vmatprep.subr.bf16.mxu0 %v1816_v48  ;;  %vm1129_vm7 = vcmp.ne.s16.totalorder %v965_v45, 0  ;;  %v1205_v27 = vunpack.c.l.b16 %v1173_v23  ;;  %v1172_v28 = vsel %vm2118_vm5, 65537, %v1925_v24  ;;  %v1155_v52 = vsel %vm2147_vm12, 65537, %v1925_v24 }
 0x126   :  { %vm1128_vm6 = vcmp.ne.s16.totalorder %v958_v44, 0  ;;  %v1161_v53 = vsel %vm1129_vm7, 65537, %v1925_v24  ;;  %v1204_v30 = vunpack.c.l.b16 %v1172_v28  ;;  %vm1127_vm0 = vcmp.ne.s16.totalorder %v951_v25, 0 }
 0x127   :  { %v1160_v54 = vsel %vm1128_vm6, 65537, %v1925_v24  ;;  %vm1237_vm7 = vcmp.ne.s32.totalorder %v1205_v27, 0  ;;  %vm2219_vm12 = vcmp.ne.s16.totalorder %v1035_v12, 0  ;;  %v1159_v61 = vsel %vm1127_vm0, 65537, %v1925_v24 }
 0x128   :  { %1735 = vmatpush3.bf16.msra.mxu0 %v1816_v48  ;;  %v892_v48 = vsel %vm876_vm2, 65537, %v1925_v24  ;;  %v800_v2 = vpop.permute.xlu0 %799  ;;  %v856_v17 = vpop.permute.xlu1 %855  ;;  %vm875_vm2 = vcmp.gt.bf16.partialorder %v2092_v31, 1056980736  ;;  %v1269_v35 = vsel %vm1237_vm7, 1, %v1925_v24  ;;  %vm1236_vm5 = vcmp.ne.s32.totalorder %v1204_v30, 0 }
 0x129   :  { %1736 = vmatprep.subr.bf16.mxu0 %v1817_v58  ;;  %v1070_v60 = vrot.slane %v892_v48, %v2073_v3  ;;  %v1077_v63 = vrot.slane %v892_v48, %v2076_v4  ;;  %vm870_vm14 = vcmp.gt.bf16.partialorder %v800_v2, 1056980736  ;;  %vm878_vm6 = vcmp.gt.bf16.partialorder %v856_v17, 1056980736 }
 0x12a   :  { %v886_v16 = vsel %vm870_vm14, 65537, %v1925_v24  ;;  %v894_v32 = vsel %vm878_vm6, 65537, %v1925_v24  ;;  %v1268_v38 = vsel %vm1236_vm5, 1, %v1925_v24  ;;  %v891_v50 = vsel %vm875_vm2, 65537, %v1925_v24 }
 0x12b   :  { %vm2155_vm13 = vcmp.ne.s16.totalorder %v1070_v60, 0  ;;  %vm2159_vm15 = vcmp.ne.s16.totalorder %v1077_v63, 0  ;;  %v986_v20 = vrot.slane %v886_v16, %v2073_v3  ;;  %v993_v21 = vrot.slane %v886_v16, %v2076_v4 }
 0x12c   :  { %1737 = vmatpush3.bf16.msra.mxu0 %v1817_v58  ;;  %v1193_v58 = vunpack.c.l.b16 %v1161_v53  ;;  %v1177_v33 = vsel %vm2159_vm15, 65537, %v1925_v24  ;;  %v1176_v34 = vsel %vm2155_vm13, 65537, %v1925_v24  ;;  %v1098_v36 = vrot.slane %v894_v32, %v2073_v3  ;;  %v863_v23 = vpop.permute.xlu1 %862 }
 0x12d   :  { %1738 = vmatprep.subr.bf16.mxu0 %v1818_v59  ;;  %vm2181_vm3 = vcmp.ne.s16.totalorder %v986_v20, 0  ;;  %vm1133_vm4 = vcmp.ne.s16.totalorder %v993_v21, 0  ;;  %v1105_v37 = vrot.slane %v894_v32, %v2076_v4  ;;  %v1209_v39 = vunpack.c.l.b16 %v1177_v33 }
 0x12e   :  { %vm1225_vm9 = vcmp.ne.s32.totalorder %v1193_v58, 0  ;;  %v1208_v40 = vunpack.c.l.b16 %v1176_v34  ;;  %v1165_v41 = vsel %vm1133_vm4, 65537, %v1925_v24  ;;  %vm1148_vm8 = vcmp.ne.s16.totalorder %v1098_v36, 0 }
 0x12f   :  { %v1257_v7 = vsel %vm1225_vm9, 1, %v1925_v24  ;;  %vm1149_vm9 = vcmp.ne.s16.totalorder %v1105_v37, 0  ;;  %v1197_v42 = vunpack.c.l.b16 %v1165_v41  ;;  %v1164_v43 = vsel %vm2181_vm3, 65537, %v1925_v24 }
 0x130   :  { %1739 = vmatpush3.bf16.msra.mxu0 %v1818_v59  ;;  %v1192_v59 = vunpack.c.l.b16 %v1160_v54  ;;  %1308 = vperm.xlu0 %1807, %v1257_v7   ;;  %vm1240_vm11 = vcmp.ne.s32.totalorder %v1208_v40, 0  ;;  %v1196_v44 = vunpack.c.l.b16 %v1164_v43  ;;  %v1181_v45 = vsel %vm1149_vm9, 65537, %v1925_v24  ;;  %v2271_v43 = vld [vmem:[#allocation3 + $0x8] sm:$0xff] }
 0x131   :  { %v1272_v47 = vsel %vm1240_vm11, 1, %v1925_v24  ;;  %vm1229_vm13 = vcmp.ne.s32.totalorder %v1197_v42, 0  ;;  %v1213_v48 = vunpack.c.l.b16 %v1181_v45  ;;  %v1180_v51 = vsel %vm1148_vm8, 65537, %v1925_v24  ;;  %v220_v42 = vld [vmem:[#allocation3] sm:$0xff] }
 0x132   :  { %vm1224_vm10 = vcmp.ne.s32.totalorder %v1192_v59, 0  ;;  %vm1228_vm14 = vcmp.ne.s32.totalorder %v1196_v44, 0  ;;  %vm1126_vm15 = vcmp.ne.s16.totalorder %v944_v11, 0  ;;  %vm869_vm3 = vcmp.gt.bf16.partialorder %v2113_v49, 1056980736  ;;  %v807_v49 = vpop.permute.xlu0 %806 }
 0x133   :  { %v1256_v8 = vsel %vm1224_vm10, 1, %v1925_v24  ;;  %vm1241_vm10 = vcmp.ne.s32.totalorder %v1209_v39, 0  ;;  %v1212_v53 = vunpack.c.l.b16 %v1180_v51  ;;  %v1261_v54 = vsel %vm1229_vm13, 1, %v1925_v24 }
 0x134   :  { %1305 = vperm.xlu1 %1808, %v1256_v8   ;;  %1332 = vperm.xlu0 %1807, %v1265_v15   ;;  %v1273_v46 = vsel %vm1241_vm10, 1, %v1925_v24  ;;  %v1260_v55 = vsel %vm1228_vm14, 1, %v1925_v24  ;;  %v1187_v31 = vunpack.c.l.b16 %v1155_v52  ;;  %v1154_v58 = vsel %vm2165_vm1, 65537, %v1925_v24 }
 0x135   :  { %vm1245_vm2 = vcmp.ne.s32.totalorder %v1213_v48, 0  ;;  %vm1244_vm4 = vcmp.ne.s32.totalorder %v1212_v53, 0  ;;  %v1186_v59 = vunpack.c.l.b16 %v1154_v58  ;;  %v1158_v62 = vsel %vm1126_vm15, 65537, %v1925_v24 }
 0x136   :  { %vm1138_vm6 = vcmp.ne.s16.totalorder %v1028_v6, 0  ;;  %v1056_v63 = vrot.slane %v891_v50, %v2073_v3  ;;  %v1063_v0 = vrot.slane %v891_v50, %v2076_v4  ;;  %v885_v2 = vsel %vm869_vm3, 65537, %v1925_v24 }
 0x137   :  { %vm877_vm1 = vcmp.gt.bf16.partialorder %v2125_v56, 1056980736  ;;  %v1277_v5 = vsel %vm1245_vm2, 1, %v1925_v24  ;;  %v1276_v7 = vsel %vm1244_vm4, 1, %v1925_v24  ;;  %vm1219_vm7 = vcmp.ne.s32.totalorder %v1187_v31, 0 }
 0x138   :  { %1329 = vperm.xlu1 %1808, %v1264_v19   ;;  %1344 = vperm.xlu0 %1807, %v1269_v35   ;;  %vm1218_vm5 = vcmp.ne.s32.totalorder %v1186_v59, 0  ;;  %v1191_v57 = vunpack.c.l.b16 %v1159_v61  ;;  %v1190_v6 = vunpack.c.l.b16 %v1158_v62  ;;  %v1171_v8 = vsel %vm2219_vm12, 65537, %v1925_v24 }
 0x139   :  { %v1170_v9 = vsel %vm1138_vm6, 65537, %v1925_v24  ;;  %vm2240_vm8 = vcmp.ne.s16.totalorder %v1056_v63, 0  ;;  %vm1143_vm9 = vcmp.ne.s16.totalorder %v1063_v0, 0  ;;  %v972_v11 = vrot.slane %v885_v2, %v2073_v3 }
 0x13a   :  { %v979_v12 = vrot.slane %v885_v2, %v2076_v4  ;;  %v893_v13 = vsel %vm877_vm1, 65537, %v1925_v24  ;;  %v1251_v14 = vsel %vm1219_vm7, 1, %v1925_v24  ;;  %v1250_v15 = vsel %vm1218_vm5, 1, %v1925_v24 }
 0x13b   :  { %v1203_v16 = vunpack.c.l.b16 %v1171_v8  ;;  %vm1223_vm10 = vcmp.ne.s32.totalorder %v1191_v57, 0  ;;  %vm1222_vm11 = vcmp.ne.s32.totalorder %v1190_v6, 0  ;;  %v1202_v17 = vunpack.c.l.b16 %v1170_v9 }
 0x13c   :  { %1341 = vperm.xlu1 %1808, %v1268_v38   ;;  %1356 = vperm.xlu0 %1807, %v1273_v46   ;;  %vm871_vm13 = vcmp.gt.bf16.partialorder %v807_v49, 1056980736  ;;  %v1928_v18 = vmov 1966171168   ;;  %v1175_v20 = vsel %vm1143_vm9, 65537, %v1925_v24  ;;  %v1174_v21 = vsel %vm2240_vm8, 65537, %v1925_v24 }
 0x13d   :  { %v226_v19 = vunpack.c.l.s4 %v1928_v18  ;;  %vm1130_vm14 = vcmp.ne.s16.totalorder %v972_v11, 0  ;;  %vm1131_vm15 = vcmp.ne.s16.totalorder %v979_v12, 0  ;;  %v1084_v56 = vrot.slane %v893_v13, %v2073_v3 }
 0x13e   :  { %v1091_v25 = vrot.slane %v893_v13, %v2076_v4  ;;  %v1255_v27 = vsel %vm1223_vm10, 1, %v1925_v24  ;;  %v1254_v28 = vsel %vm1222_vm11, 1, %v1925_v24  ;;  %vm1235_vm0 = vcmp.ne.s32.totalorder %v1203_v16, 0 }
 0x13f   :  { %v887_v29 = vsel %vm871_vm13, 65537, %v1925_v24  ;;  %vm1234_vm3 = vcmp.ne.s32.totalorder %v1202_v17, 0  ;;  %v1207_v30 = vunpack.c.l.b16 %v1175_v20  ;;  %v1206_v32 = vunpack.c.l.b16 %v1174_v21 }
 0x140   :  { %1353 = vperm.xlu1 %1808, %v1272_v47   ;;  %1320 = vperm.xlu0 %1807, %v1261_v54   ;;  %vm879_vm2 = vcmp.gt.bf16.partialorder %v863_v23, 1056980736  ;;  %v1163_v33 = vsel %vm1131_vm15, 65537, %v1925_v24  ;;  %v1162_v34 = vsel %vm1130_vm14, 65537, %v1925_v24  ;;  %vm2262_vm4 = vcmp.ne.s16.totalorder %v1084_v56, 0 }
 0x141   :  { %vm1147_vm12 = vcmp.ne.s16.totalorder %v1091_v25, 0  ;;  %v1000_v36 = vrot.slane %v887_v29, %v2073_v3  ;;  %v1007_v37 = vrot.slane %v887_v29, %v2076_v4  ;;  %v227_v38 = vunpack.c.0.s8 %v226_v19 }
 0x142   :  { %v1267_v39 = vsel %vm1235_vm0, 1, %v1925_v24  ;;  %v1266_v40 = vsel %vm1234_vm3, 1, %v1925_v24  ;;  %v895_v41 = vsel %vm879_vm2, 65537, %v1925_v24  ;;  %vm1239_vm6 = vcmp.ne.s32.totalorder %v1207_v30, 0 }
 0x143   :  { %vm1238_vm1 = vcmp.ne.s32.totalorder %v1206_v32, 0  ;;  %v1195_v44 = vunpack.c.l.b16 %v1163_v33  ;;  %v1194_v45 = vunpack.c.l.b16 %v1162_v34  ;;  %v1179_v46 = vsel %vm1147_vm12, 65537, %v1925_v24 }
 0x144   :  { %1317 = vperm.xlu1 %1808, %v1260_v55   ;;  %1368 = vperm.xlu0 %1807, %v1277_v5   ;;  %v1178_v47 = vsel %vm2262_vm4, 65537, %v1925_v24  ;;  %vm1134_vm7 = vcmp.ne.s16.totalorder %v1000_v36, 0  ;;  %vm1135_vm5 = vcmp.ne.s16.totalorder %v1007_v37, 0  ;;  %v1112_v48 = vrot.slane %v895_v41, %v2073_v3 }
 0x145   :  { %v1119_v50 = vrot.slane %v895_v41, %v2076_v4  ;;  %v222_v51 = vpack.c.bf16 %v2271_v43, %v220_v42  ;;  %v2281_v52 = vsub.s32 %v227_v38, %v2045_v22  ;;  %v1271_v53 = vsel %vm1239_vm6, 1, %v1925_v24 }
 0x146   :  { %v1270_v54 = vsel %vm1238_vm1, 1, %v1925_v24  ;;  %vm1227_vm8 = vcmp.ne.s32.totalorder %v1195_v44, 0  ;;  %vm1226_vm9 = vcmp.ne.s32.totalorder %v1194_v45, 0  ;;  %v1211_v55 = vunpack.c.l.b16 %v1179_v46 }
 0x147   :  { %v1210_v31 = vunpack.c.l.b16 %v1178_v47  ;;  %v1167_v58 = vsel %vm1135_vm5, 65537, %v1925_v24  ;;  %v1166_v59 = vsel %vm1134_vm7, 65537, %v1925_v24  ;;  %vm1150_vm10 = vcmp.ne.s16.totalorder %v1112_v48, 0 }
 0x148   :  { %1365 = vperm.xlu1 %1808, %v1276_v7   ;;  %1290 = vperm.xlu0 %1807, %v1251_v14   ;;  %vm1151_vm11 = vcmp.ne.s16.totalorder %v1119_v50, 0  ;;  %v231_v3 = vrot.slane %v222_v51, %v2281_v52  ;;  %v1259_v22 = vsel %vm1227_vm8, 1, %v1925_v24  ;;  %v1258_v4 = vsel %vm1226_vm9, 1, %v1925_v24 }
 0x149   :  { %vm1243_vm13 = vcmp.ne.s32.totalorder %v1211_v55, 0  ;;  %vm1242_vm14 = vcmp.ne.s32.totalorder %v1210_v31, 0  ;;  %v1199_v60 = vunpack.c.l.b16 %v1167_v58  ;;  %v1198_v61 = vunpack.c.l.b16 %v1166_v59 }
 0x14a   :  { %v1183_v62 = vsel %vm1151_vm11, 65537, %v1925_v24  ;;  %v1182_v63 = vsel %vm1150_vm10, 65537, %v1925_v24  ;;  %v239_v0 = vcombine.high %v231_v3, %v231_v3  ;;  %v1275_v2 = vsel %vm1243_vm13, 1, %v1925_v24 }
 0x14b   :  { %v1274_v5 = vsel %vm1242_vm14, 1, %v1925_v24  ;;  %vm1231_vm15 = vcmp.ne.s32.totalorder %v1199_v60, 0  ;;  %vm1230_vm0 = vcmp.ne.s32.totalorder %v1198_v61, 0  ;;  %v1215_v7 = vunpack.c.l.b16 %v1183_v62 }
 0x14c   :  { %1287 = vperm.xlu1 %1808, %v1250_v15   ;;  %1302 = vperm.xlu0 %1807, %v1255_v27   ;;  %v1214_v57 = vunpack.c.l.b16 %v1182_v63  ;;  %v261_v6 = vrot.slane %v239_v0, %v2281_v52  ;;  %v1263_v8 = vsel %vm1231_vm15, 1, %v1925_v24  ;;  %v1262_v9 = vsel %vm1230_vm0, 1, %v1925_v24 }
 0x14d   :  { %vm1247_vm3 = vcmp.ne.s32.totalorder %v1215_v7, 0  ;;  %v1664_v12 = vpack.c.bf16 %v2271_v43, %v2271_v43  ;;  %v247_v13 = vrot.slane %v231_v3, %v2281_v52 }
 0x14e   :  { %vm1246_vm2 = vcmp.ne.s32.totalorder %v1214_v57, 0  ;;  %v271_v49 = vcombine.high %v261_v6, %v261_v6  ;;  %v1279_v10 = vsel %vm1247_vm3, 1, %v1925_v24  ;;  %v276_v17 = vunpack.i.h.s16 %v261_v6 }
 0x14f   :  { %v1278_v11 = vsel %vm1246_vm2, 1, %v1925_v24  ;;  %v274_v15 = vunpack.i.h.s16 %v247_v13  ;;  %v238_v16 = vrot.slane %v1664_v12, %v2281_v52  ;;  %v1665_v18 = vpack.i.b16 %v247_v13, %v247_v13 }
 0x150   :  { %1299 = vperm.xlu1 %1808, %v1254_v28   ;;  %1338 = vperm.xlu0 %1807, %v1267_v39   ;;  %v280_v14 = vunpack.i.h.s16 %v271_v49  ;;  %v1668_v20 = vpack.i.b16 %v271_v49, %v271_v49  ;;  %v1666_v56 = vpack.i.b16 %v261_v6, %v261_v6  ;;  %v293_v29 = vpack.i.b16 %v276_v17, %v276_v17 }
 0x151   :  { %v254_v19 = vrot.slane %v238_v16, %v2281_v52  ;;  %v291_v21 = vpack.i.b16 %v274_v15, %v274_v15  ;;  %v240_v28 = vcombine.high %v238_v16, %v238_v16  ;;  %v309_v30 = vrot.slane %v1665_v18, %v2050_v26 }
 0x152   :  { %v297_v23 = vpack.i.b16 %v280_v14, %v280_v14  ;;  %v333_v32 = vrot.slane %v1668_v20, %v2050_v26  ;;  %v317_v35 = vrot.slane %v1666_v56, %v2050_v26  ;;  %v269_v38 = vcombine.high %v247_v13, %v247_v13 }
 0x153   :  { %v1669_v25 = vpack.i.b16 %v254_v19, %v254_v19  ;;  %v282_v27 = vunpack.i.h.s16 %v254_v19  ;;  %v313_v33 = vrot.slane %v291_v21, %v2050_v26  ;;  %v268_v39 = vrot.slane %v240_v28, %v2281_v52 }
 0x154   :  { %1335 = vperm.xlu1 %1808, %v1266_v40   ;;  %1350 = vperm.xlu0 %1807, %v1271_v53   ;;  %v337_v34 = vrot.slane %v297_v23, %v2050_v26  ;;  %v321_v40 = vrot.slane %v293_v29, %v2050_v26  ;;  %v371_v41 = vpack.i.b16 %v309_v30, %v309_v30  ;;  %v278_v51 = vunpack.i.h.s16 %v269_v38 }
 0x155   :  { %v341_v36 = vrot.slane %v1669_v25, %v2050_v26  ;;  %v299_v37 = vpack.i.b16 %v282_v27, %v282_v27  ;;  %v1667_v42 = vpack.i.b16 %v269_v38, %v269_v38  ;;  %v1670_v43 = vpack.i.b16 %v268_v39, %v268_v39 }
 0x156   :  { %v413_v44 = vpack.i.b16 %v333_v32, %v333_v32  ;;  %v378_v45 = vpack.i.b16 %v313_v33, %v313_v33  ;;  %v420_v46 = vpack.i.b16 %v337_v34, %v337_v34  ;;  %v385_v47 = vpack.i.b16 %v317_v35, %v317_v35 }
 0x157   :  { %v427_v48 = vpack.i.b16 %v341_v36, %v341_v36  ;;  %v345_v50 = vrot.slane %v299_v37, %v2050_v26  ;;  %v392_v53 = vpack.i.b16 %v321_v40, %v321_v40  ;;  %v376_v55 = vrot.slane %v371_v41, %v2050_v26 }
 0x158   :  { %1347 = vperm.xlu1 %1808, %v1270_v54   ;;  %1314 = vperm.xlu0 %1807, %v1259_v22   ;;  %v325_v31 = vrot.slane %v1667_v42, %v2050_v26  ;;  %v349_v52 = vrot.slane %v1670_v43, %v2050_v26  ;;  %v284_v58 = vunpack.i.h.s16 %v268_v39  ;;  %v418_v3 = vrot.slane %v413_v44, %v2050_v26 }
 0x159   :  { %v383_v22 = vrot.slane %v378_v45, %v2050_v26  ;;  %v390_v60 = vrot.slane %v385_v47, %v2050_v26  ;;  %v432_v62 = vrot.slane %v427_v48, %v2050_v26  ;;  %v434_v63 = vpack.i.b16 %v345_v50, %v345_v50 }
 0x15a   :  { %v295_v0 = vpack.i.b16 %v278_v51, %v278_v51  ;;  %v397_v57 = vrot.slane %v392_v53, %v2050_v26  ;;  %v399_v6 = vpack.i.b16 %v325_v31, %v325_v31  ;;  %v272_v33 = vcombine.high %v268_v39, %v268_v39 }
 0x15b   :  { %v439_v16 = vrot.slane %v434_v63, %v2050_v26 }
 0x15c   :  { %1311 = vperm.xlu1 %1808, %v1258_v4   ;;  %1362 = vperm.xlu0 %1807, %v1275_v2   ;;  %v425_v4 = vrot.slane %v420_v46, %v2050_v26  ;;  %v270_v2 = vcombine.high %v254_v19, %v254_v19  ;;  %v329_v17 = vrot.slane %v295_v0, %v2050_v26  ;;  %v288_v44 = vunpack.i.h.s16 %v272_v33 }
 0x15d   :  { %v404_v23 = vrot.slane %v399_v6, %v2050_v26  ;;  %v1672_v42 = vpack.i.b16 %v272_v33, %v272_v33 }
 0x15e   :  { %v1671_v49 = vpack.i.b16 %v270_v2, %v270_v2  ;;  %v286_v27 = vunpack.i.h.s16 %v270_v2  ;;  %v406_v32 = vpack.i.b16 %v329_v17, %v329_v17 }
 0x15f   :  { %v365_v53 = vrot.slane %v1672_v42, %v2050_v26 }
 0x160   :  { %1359 = vperm.xlu1 %1808, %v1274_v5   ;;  %1326 = vperm.xlu0 %1807, %v1263_v8   ;;  %v441_v8 = vpack.i.b16 %v349_v52, %v349_v52  ;;  %v357_v25 = vrot.slane %v1671_v49, %v2050_v26  ;;  %v303_v37 = vpack.i.b16 %v286_v27, %v286_v27 }
 0x161   :  { %v411_v43 = vrot.slane %v406_v32, %v2050_v26  ;;  %v305_v52 = vpack.i.b16 %v288_v44, %v288_v44 }
 0x162   :  { %v446_v30 = vrot.slane %v441_v8, %v2050_v26  ;;  %v455_v41 = vpack.i.b16 %v357_v25, %v357_v25  ;;  %v361_v47 = vrot.slane %v303_v37, %v2050_v26 }
 0x164   :  { %1323 = vperm.xlu1 %1808, %v1262_v9   ;;  %1374 = vperm.xlu0 %1807, %v1279_v10   ;;  %v301_v9 = vpack.i.b16 %v284_v58, %v284_v58  ;;  %v460_v51 = vrot.slane %v455_v41, %v2050_v26  ;;  %v462_v31 = vpack.i.b16 %v361_v47, %v361_v47 }
 0x166   :  { %v353_v56 = vrot.slane %v301_v9, %v2050_v26 }
 0x168   :  { %1371 = vperm.xlu1 %1808, %v1278_v11   ;;  %v448_v36 = vpack.i.b16 %v353_v56, %v353_v56 }
 0x16a   :  { %v453_v39 = vrot.slane %v448_v36, %v2050_v26 }
 0x19d   :  { %v1285_v49 = vpop.permute.xlu1 %1284 }
 0x19e   :  { %vm1377_vm4 = vcmp.eq.s32.totalorder %v1285_v49, 1 }
 0x1e6   :  { %v213_v54 = vpop.f32.mrb[0].mxu0 }
 0x1e7   :  { %v1722_v59 = vpop.f32.mrb[1].mxu0 }
 0x1e8   :  { %v216_v61 = vpop.f32.mrb[2].mxu0  ;;  %v469_v59 = vpack.i.b16 %v365_v53, %v365_v53 }
 0x1e9   :  { %v2321_v5 = vpack.c.bf16 %v216_v61, %v213_v54  ;;  %v1723_v7 = vpop.f32.mrb[3].mxu0 }
 0x1eb   :  { %v482_v10 = vadd.bf16 %v376_v55, %v2321_v5  ;;  %v488_v11 = vadd.bf16 %v418_v3, %v2321_v5  ;;  %v483_v12 = vadd.bf16 %v383_v22, %v2321_v5  ;;  %v489_v13 = vadd.bf16 %v425_v4, %v2321_v5 }
 0x1ec   :  { %v484_v14 = vadd.bf16 %v390_v60, %v2321_v5  ;;  %v490_v15 = vadd.bf16 %v432_v62, %v2321_v5  ;;  %v485_v34 = vadd.bf16 %v397_v57, %v2321_v5  ;;  %v491_v35 = vadd.bf16 %v439_v16, %v2321_v5 }
 0x1ed   :  { %v498_v18 = vmax.bf16 %v1925_v24, %v482_v10  ;;  %v504_v19 = vmax.bf16 %v1925_v24, %v488_v11  ;;  %v499_v20 = vmax.bf16 %v1925_v24, %v483_v12  ;;  %v505_v21 = vmax.bf16 %v1925_v24, %v489_v13  ;;  %v1282_v10 = vpop.permute.xlu0 %1281  ;;  %v2371_v11 = vpop.permute.xlu1 %1293 }
 0x1ee   :  { %v500_v28 = vmax.bf16 %v1925_v24, %v484_v14  ;;  %v506_v29 = vmax.bf16 %v1925_v24, %v490_v15  ;;  %v486_v38 = vadd.bf16 %v404_v23, %v2321_v5  ;;  %v492_v40 = vadd.bf16 %v446_v30, %v2321_v5 }
 0x1ef   :  { %1740 = vmatprep.mubr.bf16.mxu0 %v498_v18  ;;  %1752 = vmatprep.mubr.bf16.mxu1 %v504_v19  ;;  %v501_v45 = vmax.bf16 %v1925_v24, %v485_v34  ;;  %v507_v46 = vmax.bf16 %v1925_v24, %v491_v35  ;;  %v487_v54 = vadd.bf16 %v411_v43, %v2321_v5  ;;  %vm1376_vm12 = vcmp.eq.s32.totalorder %v1282_v10, 1 }
 0x1f0   :  { %1741 = vmatmul.mubr.bf16.vlgmr.msra.gmra.mrb[4].mxu0 %v499_v20  ;;  %1753 = vmatmul.mubr.bf16.vlgmr.msra.gmra.mrb[0].mxu1 %v505_v21  ;;  %v502_v48 = vmax.bf16 %v1925_v24, %v486_v38  ;;  %v508_v50 = vmax.bf16 %v1925_v24, %v492_v40  ;;  %v493_v55 = vadd.bf16 %v453_v39, %v2321_v5  ;;  %vm1380_vm10 = vcmp.eq.s32.totalorder %v2371_v11, 1 }
 0x1f1   :  { %1744 = vmatprep.mubr.bf16.mxu0 %v500_v28  ;;  %1756 = vmatprep.mubr.bf16.mxu1 %v506_v29  ;;  %v494_v58 = vadd.bf16 %v460_v51, %v2321_v5  ;;  %v503_v3 = vmax.bf16 %v1925_v24, %v487_v54  ;;  %v467_v4 = vrot.slane %v462_v31, %v2050_v26  ;;  %v2373_v12 = vpop.permute.xlu0 %1296  ;;  %v2375_v13 = vpop.permute.xlu1 %1305 }
 0x1f2   :  { %v509_v22 = vmax.bf16 %v1925_v24, %v493_v55  ;;  %v369_v60 = vrot.slane %v305_v52, %v2050_v26  ;;  %v474_v62 = vrot.slane %v469_v59, %v2050_v26  ;;  %vm1381_vm11 = vcmp.eq.s32.totalorder %v2373_v12, 1 }
 0x1f3   :  { %v510_v61 = vmax.bf16 %v1925_v24, %v494_v58  ;;  %v495_v63 = vadd.bf16 %v467_v4, %v2321_v5 }
 0x1f4   :  { %v476_v0 = vpack.i.b16 %v369_v60, %v369_v60  ;;  %v496_v2 = vadd.bf16 %v474_v62, %v2321_v5 }
 0x1f5   :  { %v511_v7 = vmax.bf16 %v1925_v24, %v495_v63  ;;  %v2377_v14 = vpop.permute.xlu0 %1308 }
 0x1f6   :  { %v481_v57 = vrot.slane %v476_v0, %v2050_v26  ;;  %v512_v6 = vmax.bf16 %v1925_v24, %v496_v2  ;;  %v2379_v26 = vpop.permute.xlu1 %1329 }
 0x1f7   :  { %vm1392_vm13 = vcmp.eq.s32.totalorder %v2379_v26, 1 }
 0x1f8   :  { %1745 = vmatmul.mubr.bf16.gmra.mrb[8].mxu0 %v501_v45  ;;  %1757 = vmatmul.mubr.bf16.gmra.mrb[4].mxu1 %v507_v46  ;;  %v497_v8 = vadd.bf16 %v481_v57, %v2321_v5 }
 0x1f9   :  { %1748 = vmatprep.mubr.bf16.mxu0 %v502_v48  ;;  %1760 = vmatprep.mubr.bf16.mxu1 %v508_v50  ;;  %v2381_v15 = vpop.permute.xlu0 %1332 }
 0x1fa   :  { %v513_v9 = vmax.bf16 %v1925_v24, %v497_v8  ;;  %v2383_v16 = vpop.permute.xlu1 %1341  ;;  %vm1393_vm14 = vcmp.eq.s32.totalorder %v2381_v15, 1 }
 0x1fd   :  { %v2385_v5 = vpop.permute.xlu0 %1344 }
 0x1fe   :  { %v2387_v24 = vpop.permute.xlu1 %1353 }
 0x200   :  { %1749 = vmatmul.mubr.bf16.gmra.mrb[12].mxu0 %v503_v3  ;;  %1761 = vmatmul.mubr.bf16.gmra.mrb[8].mxu1 %v509_v22 }
 0x201   :  { %1764 = vmatprep.mubr.bf16.mxu1 %v510_v61  ;;  %v2389_v17 = vpop.permute.xlu0 %1356 }
 0x202   :  { %v1318_v18 = vpop.permute.xlu1 %1317 }
 0x203   :  { %vm1388_vm6 = vcmp.eq.s32.totalorder %v1318_v18, 1 }
 0x205   :  { %v1321_v19 = vpop.permute.xlu0 %1320 }
 0x206   :  { %v2391_v20 = vpop.permute.xlu1 %1365  ;;  %vm1389_vm1 = vcmp.eq.s32.totalorder %v1321_v19, 1 }
 0x208   :  { %1765 = vmatmul.mubr.bf16.gmra.mrb[12].mxu1 %v511_v7 }
 0x209   :  { %1768 = vmatprep.mubr.bf16.mxu1 %v512_v6  ;;  %v2393_v21 = vpop.permute.xlu0 %1368 }
 0x20a   :  { %v1288_v23 = vpop.permute.xlu1 %1287 }
 0x20b   :  { %vm1378_vm7 = vcmp.eq.s32.totalorder %v1288_v23, 1 }
 0x20d   :  { %v1291_v56 = vpop.permute.xlu0 %1290 }
 0x20e   :  { %v2395_v25 = vpop.permute.xlu1 %1299  ;;  %vm1379_vm5 = vcmp.eq.s32.totalorder %v1291_v56, 1 }
 0x20f   :  { %vm1382_vm15 = vcmp.eq.s32.totalorder %v2395_v25, 1 }
 0x210   :  { %1769 = vmatmul.mubr.bf16.gmra.mrb[16].mxu1 %v513_v9 }
 0x211   :  { %v2397_v27 = vpop.permute.xlu0 %1302 }
 0x212   :  { %v2399_v28 = vpop.permute.xlu1 %1335  ;;  %vm1383_vm0 = vcmp.eq.s32.totalorder %v2397_v27, 1 }
 0x213   :  { %vm1394_vm3 = vcmp.eq.s32.totalorder %v2399_v28, 1 }
 0x215   :  { %v2401_v29 = vpop.permute.xlu0 %1338 }
 0x216   :  { %v2403_v30 = vpop.permute.xlu1 %1347  ;;  %vm1395_vm2 = vcmp.eq.s32.totalorder %v2401_v29, 1 }
 0x219   :  { %v2405_v32 = vpop.permute.xlu0 %1350 }
 0x21a   :  { %v2407_v33 = vpop.permute.xlu1 %1311 }
 0x21d   :  { %v2409_v34 = vpop.permute.xlu0 %1314 }
 0x21e   :  { %v2411_v35 = vpop.permute.xlu1 %1359 }
 0x221   :  { %v2413_v36 = vpop.permute.xlu0 %1362 }
 0x222   :  { %v1324_v37 = vpop.permute.xlu1 %1323 }
 0x223   :  { %vm1390_vm8 = vcmp.eq.s32.totalorder %v1324_v37, 1 }
 0x225   :  { %v1327_v38 = vpop.permute.xlu0 %1326 }
 0x226   :  { %vm1391_vm9 = vcmp.eq.s32.totalorder %v1327_v38, 1 }
 0x2c3   :  { %v1742_v40 = vpop.f32.mrb[4].mxu0  ;;  %v1754_v41 = vpop.f32.mrb[0].mxu1 }
 0x2c4   :  { %v1410_v42 = vsel %vm1378_vm7, %v1742_v40, -1e+30  ;;  %v1422_v43 = vsel %vm1390_vm8, %v1754_v41, -1e+30  ;;  %v612_v44 = vpop.f32.mrb[5].mxu0  ;;  %v660_v45 = vpop.f32.mrb[1].mxu1 }
 0x2c5   :  { %v1408_v46 = vsel %vm1376_vm12, %v612_v44, -1e+30  ;;  %v1420_v39 = vsel %vm1388_vm6, %v660_v45, -1e+30  ;;  %v1743_v47 = vpop.f32.mrb[6].mxu0  ;;  %v1755_v48 = vpop.f32.mrb[2].mxu1 }
 0x2c6   :  { %v1411_v50 = vsel %vm1379_vm5, %v1743_v47, -1e+30  ;;  %v1423_v51 = vsel %vm1391_vm9, %v1755_v48, -1e+30  ;;  %v615_v53 = vpop.f32.mrb[7].mxu0  ;;  %v663_v54 = vpop.f32.mrb[3].mxu1 }
 0x2c7   :  { %v1449_v55 = vmax.f32 %v1410_v42, %v1411_v50  ;;  %v1491_v31 = vmax.f32 %v1422_v43, %v1423_v51  ;;  %v1409_v52 = vsel %vm1377_vm4, %v615_v53, -1e+30  ;;  %v1421_v58 = vsel %vm1389_vm1, %v663_v54, -1e+30 }
 0x2c8   :  { %v1442_v59 = vmax.f32 %v1408_v46, %v1409_v52  ;;  %v1484_v3 = vmax.f32 %v1420_v39, %v1421_v58  ;;  %vm1398_vm4 = vcmp.eq.s32.totalorder %v2403_v30, 1  ;;  %vm1386_vm12 = vcmp.eq.s32.totalorder %v2407_v33, 1 }
 0x2c9   :  { %v1450_v22 = vrot.slane %v1449_v55, 4  ;;  %v1492_v4 = vrot.slane %v1491_v31, 4  ;;  %vm1384_vm6 = vcmp.eq.s32.totalorder %v2375_v13, 1  ;;  %vm1396_vm1 = vcmp.eq.s32.totalorder %v2383_v16, 1 }
 0x2ca   :  { %v1443_v60 = vrot.slane %v1442_v59, 4  ;;  %v1485_v61 = vrot.slane %v1484_v3, 4  ;;  %vm1387_vm7 = vcmp.eq.s32.totalorder %v2409_v34, 1  ;;  %vm1399_vm5 = vcmp.eq.s32.totalorder %v2405_v32, 1 }
 0x2cb   :  { %v1451_v62 = vmax.f32 %v1449_v55, %v1450_v22  ;;  %v1493_v63 = vmax.f32 %v1491_v31, %v1492_v4  ;;  %v1746_v0 = vpop.f32.mrb[8].mxu0  ;;  %v1758_v2 = vpop.f32.mrb[4].mxu1  ;;  %vm1385_vm8 = vcmp.eq.s32.totalorder %v2377_v14, 1  ;;  %vm1570_vm9 = vcmask 1041409  }
 0x2cc   :  { %v1444_v7 = vmax.f32 %v1442_v59, %v1443_v60  ;;  %v1486_v57 = vmax.f32 %v1484_v3, %v1485_v61  ;;  %v628_v6 = vpop.f32.mrb[9].mxu0  ;;  %v676_v8 = vpop.f32.mrb[5].mxu1  ;;  %v1414_v10 = vsel %vm1382_vm15, %v1746_v0, -1e+30  ;;  %v1426_v18 = vsel %vm1394_vm3, %v1758_v2, -1e+30 }
 0x2cd   :  { %v1452_v9 = vrot.slane %v1451_v62, 2  ;;  %v1494_v49 = vrot.slane %v1493_v63, 2  ;;  %v1412_v56 = vsel %vm1380_vm10, %v628_v6, -1e+30  ;;  %v1747_v37 = vpop.f32.mrb[10].mxu0  ;;  %v1759_v38 = vpop.f32.mrb[6].mxu1 }
 0x2ce   :  { %v1445_v19 = vrot.slane %v1444_v7, 2  ;;  %v1487_v23 = vrot.slane %v1486_v57, 2  ;;  %v1415_v25 = vsel %vm1383_vm0, %v1747_v37, -1e+30  ;;  %v1427_v28 = vsel %vm1395_vm2, %v1759_v38, -1e+30 }
 0x2cf   :  { %v1453_v40 = vmax.f32 %v1451_v62, %v1452_v9  ;;  %v631_v41 = vpop.f32.mrb[11].mxu0  ;;  %v679_v42 = vpop.f32.mrb[7].mxu1  ;;  %v2442_v43 = vmax.f32 %v1493_v63, %v1494_v49  ;;  %v1463_v11 = vmax.f32 %v1414_v10, %v1415_v25  ;;  %v1505_v45 = vmax.f32 %v1426_v18, %v1427_v28 }
 0x2d0   :  { %v1446_v44 = vmax.f32 %v1444_v7, %v1445_v19  ;;  %v1413_v39 = vsel %vm1381_vm11, %v631_v41, -1e+30  ;;  %v1425_v27 = vsel %vm1393_vm14, %v679_v42, -1e+30  ;;  %vm1397_vm10 = vcmp.eq.s32.totalorder %v2385_v5, 1 }
 0x2d1   :  { %v1454_v46 = vrot.slane %v1453_v40, 1  ;;  %v1424_v47 = vsel %vm1392_vm13, %v676_v8, -1e+30  ;;  %v1464_v48 = vrot.slane %v1463_v11, 4  ;;  %v1506_v50 = vrot.slane %v1505_v45, 4 }
 0x2d2   :  { %v1447_v29 = vrot.slane %v1446_v44, 1  ;;  %v2451_v53 = vmax.f32 %v1486_v57, %v1487_v23  ;;  %v1456_v54 = vmax.f32 %v1412_v56, %v1413_v39  ;;  %v1498_v55 = vmax.f32 %v1424_v47, %v1425_v27  ;;  %v2473_v23 = vpop.permute.xlu1 %1371 }
 0x2d3   :  { %v1455_v51 = vmax.f32 %v1453_v40, %v1454_v46  ;;  %v1750_v31 = vpop.f32.mrb[12].mxu0  ;;  %v1762_v52 = vpop.f32.mrb[8].mxu1  ;;  %v1496_v12 = vrot.slane %v2442_v43, 1  ;;  %v1465_v15 = vmax.f32 %v1463_v11, %v1464_v48  ;;  %v1507_v59 = vmax.f32 %v1505_v45, %v1506_v50 }
 0x2d4   :  { %v1448_v58 = vmax.f32 %v1446_v44, %v1447_v29  ;;  %v644_v3 = vpop.f32.mrb[13].mxu0  ;;  %v692_v22 = vpop.f32.mrb[9].mxu1  ;;  %vm1400_vm11 = vcmp.eq.s32.totalorder %v2387_v24, 1  ;;  %vm1402_vm13 = vcmp.eq.s32.totalorder %v2411_v35, 1  ;;  %v1457_v26 = vrot.slane %v1456_v54, 4 }
 0x2d5   :  { %v1499_v4 = vrot.slane %v1498_v55, 4  ;;  %v1418_v60 = vsel %vm1386_vm12, %v1750_v31, -1e+30  ;;  %v1430_v61 = vsel %vm1398_vm4, %v1762_v52, -1e+30  ;;  %v1466_v63 = vrot.slane %v1465_v15, 2  ;;  %v2477_v40 = vpop.permute.xlu0 %1374 }
 0x2d6   :  { %v2461_v62 = vsel %vm1570_vm9, %v1455_v51, %v1448_v58  ;;  %v1508_v0 = vrot.slane %v1507_v59, 2  ;;  %vm1572_vm14 = vcmask 1042434   ;;  %v1416_v2 = vsel %vm1384_vm6, %v644_v3, -1e+30  ;;  %v1751_v7 = vpop.f32.mrb[14].mxu0  ;;  %v1763_v57 = vpop.f32.mrb[10].mxu1 }
 0x2d7   :  { %vm1401_vm15 = vcmp.eq.s32.totalorder %v2389_v17, 1  ;;  %vm1403_vm0 = vcmp.eq.s32.totalorder %v2413_v36, 1  ;;  %v1458_v33 = vmax.f32 %v1456_v54, %v1457_v26  ;;  %v1500_v6 = vmax.f32 %v1498_v55, %v1499_v4  ;;  %v647_v9 = vpop.f32.mrb[15].mxu0  ;;  %v695_v49 = vpop.f32.mrb[11].mxu1 }
 0x2d8   :  { %v1428_v30 = vsel %vm1396_vm1, %v692_v22, -1e+30  ;;  %v1419_v8 = vsel %vm1387_vm7, %v1751_v7, -1e+30  ;;  %vm1574_vm3 = vcmask 1043459   ;;  %v1467_v10 = vmax.f32 %v1465_v15, %v1466_v63 }
 0x2d9   :  { %v1509_v13 = vmax.f32 %v1507_v59, %v1508_v0  ;;  %v1477_v18 = vmax.f32 %v1418_v60, %v1419_v8  ;;  %v1431_v19 = vsel %vm1399_vm5, %v1763_v57, -1e+30  ;;  %v1459_v56 = vrot.slane %v1458_v33, 2 }
 0x2da   :  { %v1501_v37 = vrot.slane %v1500_v6, 2  ;;  %v1519_v38 = vmax.f32 %v1430_v61, %v1431_v19  ;;  %v1417_v16 = vsel %vm1385_vm8, %v647_v9, -1e+30  ;;  %v1468_v34 = vrot.slane %v1467_v10, 1 }
 0x2db   :  { %v1510_v25 = vrot.slane %v1509_v13, 1  ;;  %v1478_v28 = vrot.slane %v1477_v18, 4  ;;  %v1470_v41 = vmax.f32 %v1416_v2, %v1417_v16  ;;  %v1460_v42 = vmax.f32 %v1458_v33, %v1459_v56  ;;  %v1766_v45 = vpop.f32.mrb[12].mxu1 }
 0x2dc   :  { %v1502_v44 = vmax.f32 %v1500_v6, %v1501_v37  ;;  %v1520_v11 = vrot.slane %v1519_v38, 4  ;;  %v1429_v32 = vsel %vm1397_vm10, %v695_v49, -1e+30  ;;  %vm1406_vm2 = vcmp.eq.s32.totalorder %v2473_v23, 1  ;;  %v708_v29 = vpop.f32.mrb[13].mxu1 }
 0x2dd   :  { %v1469_v46 = vmax.f32 %v1467_v10, %v1468_v34  ;;  %v1511_v39 = vmax.f32 %v1509_v13, %v1510_v25  ;;  %v1479_v27 = vmax.f32 %v1477_v18, %v1478_v28  ;;  %v1471_v14 = vrot.slane %v1470_v41, 4  ;;  %v1767_v54 = vpop.f32.mrb[14].mxu1 }
 0x2de   :  { %vm1404_vm4 = vcmp.eq.s32.totalorder %v2391_v20, 1  ;;  %vm1407_vm12 = vcmp.eq.s32.totalorder %v2477_v40, 1  ;;  %v1461_v47 = vrot.slane %v1460_v42, 1  ;;  %v1503_v48 = vrot.slane %v1502_v44, 1  ;;  %v711_v58 = vpop.f32.mrb[15].mxu1  ;;  %v1440_v40 = vld [vmem:[#allocation2] sm:$0xff] }
 0x2df   :  { %v1521_v50 = vmax.f32 %v1519_v38, %v1520_v11  ;;  %vm1576_vm6 = vcmask 1044484   ;;  %v1512_v51 = vmax.f32 %v1428_v30, %v1429_v32  ;;  %vm1405_vm1 = vcmp.eq.s32.totalorder %v2393_v21, 1 }
 0x2e0   :  { %v1480_v5 = vrot.slane %v1479_v27, 2  ;;  %v1472_v55 = vmax.f32 %v1470_v41, %v1471_v14  ;;  %vm1578_vm7 = vcmask 1045509   ;;  %v1434_v31 = vsel %vm1402_vm13, %v1766_v45, -1e+30 }
 0x2e1   :  { %v1432_v52 = vsel %vm1400_vm11, %v708_v29, -1e+30  ;;  %v1462_v15 = vmax.f32 %v1460_v42, %v1461_v47  ;;  %v1504_v59 = vmax.f32 %v1502_v44, %v1503_v48  ;;  %v1522_v3 = vrot.slane %v1521_v50, 2 }
 0x2e2   :  { %v1513_v22 = vrot.slane %v1512_v51, 4  ;;  %vm1580_vm5 = vcmask 1046534   ;;  %v1481_v26 = vmax.f32 %v1479_v27, %v1480_v5  ;;  %v1473_v4 = vrot.slane %v1472_v55, 2 }
 0x2e3   :  { %v1435_v60 = vsel %vm1403_vm0, %v1767_v54, -1e+30  ;;  %v1433_v61 = vsel %vm1401_vm15, %v711_v58, -1e+30  ;;  %v1573_v35 = vsel %vm1572_vm14, %v1462_v15, %v2461_v62  ;;  %v1584_v24 = vsel %vm1570_vm9, %v1511_v39, %v1504_v59  ;;  %v1770_v8 = vpop.f32.mrb[16].mxu1 }
 0x2e4   :  { %v1523_v63 = vmax.f32 %v1521_v50, %v1522_v3  ;;  %v1514_v0 = vmax.f32 %v1512_v51, %v1513_v22  ;;  %v1482_v2 = vrot.slane %v1481_v26, 1  ;;  %v1474_v7 = vmax.f32 %v1472_v55, %v1473_v4  ;;  %v724_v10 = vpop.f32.mrb[17].mxu1 }
 0x2e5   :  { %v1575_v57 = vsel %vm1574_vm3, %v1469_v46, %v1573_v35  ;;  %v1533_v33 = vmax.f32 %v1434_v31, %v1435_v60  ;;  %v1489_v6 = vrot.slane %v2451_v53, 1  ;;  %v1526_v36 = vmax.f32 %v1432_v52, %v1433_v61  ;;  %v1771_v37 = vpop.f32.mrb[18].mxu1 }
 0x2e6   :  { %v1515_v30 = vrot.slane %v1514_v0, 2  ;;  %vm1582_vm8 = vcmask 1047559   ;;  %v1497_v17 = vmax.f32 %v2442_v43, %v1496_v12  ;;  %v1524_v62 = vrot.slane %v1523_v63, 1  ;;  %v727_v43 = vpop.f32.mrb[19].mxu1 }
 0x2e7   :  { %v1475_v9 = vrot.slane %v1474_v7, 1  ;;  %v1534_v49 = vrot.slane %v1533_v33, 4  ;;  %v1483_v13 = vmax.f32 %v1481_v26, %v1482_v2  ;;  %v1527_v19 = vrot.slane %v1526_v36, 4 }
 0x2e8   :  { %v1516_v18 = vmax.f32 %v1514_v0, %v1515_v30  ;;  %v1438_v56 = vsel %vm1406_vm2, %v1770_v8, -1e+30  ;;  %v1436_v34 = vsel %vm1404_vm4, %v724_v10, -1e+30  ;;  %v1439_v25 = vsel %vm1407_vm12, %v1771_v37, -1e+30 }
 0x2e9   :  { %v1476_v38 = vmax.f32 %v1474_v7, %v1475_v9  ;;  %v1535_v16 = vmax.f32 %v1533_v33, %v1534_v49  ;;  %v1528_v28 = vmax.f32 %v1526_v36, %v1527_v19  ;;  %v1547_v41 = vmax.f32 %v1438_v56, %v1439_v25 }
 0x2ea   :  { %v1517_v12 = vrot.slane %v1516_v18, 1  ;;  %v1437_v42 = vsel %vm1405_vm1, %v727_v43, -1e+30  ;;  %v1490_v44 = vmax.f32 %v2451_v53, %v1489_v6  ;;  %v1525_v27 = vmax.f32 %v1523_v63, %v1524_v62  ;;  %v1441_v63 = vld [vmem:[#allocation2 + $0x8] sm:$0xff] }
 0x2eb   :  { %v1577_v23 = vsel %vm1576_vm6, %v1476_v38, %v1575_v57  ;;  %v1536_v11 = vrot.slane %v1535_v16, 2  ;;  %v1540_v32 = vmax.f32 %v1436_v34, %v1437_v42  ;;  %v1529_v46 = vrot.slane %v1528_v28, 2 }
 0x2ec   :  { %v1579_v45 = vsel %vm1578_vm7, %v1483_v13, %v1577_v23  ;;  %v1518_v20 = vmax.f32 %v1516_v18, %v1517_v12  ;;  %v1548_v39 = vrot.slane %v1547_v41, 4 }
 0x2ed   :  { %v1537_v14 = vmax.f32 %v1535_v16, %v1536_v11  ;;  %v1541_v29 = vrot.slane %v1540_v32, 4  ;;  %v1581_v47 = vsel %vm1580_vm5, %v1490_v44, %v1579_v45  ;;  %v1530_v48 = vmax.f32 %v1528_v28, %v1529_v46 }
 0x2ee   :  { %v1585_v21 = vsel %vm1572_vm14, %v1518_v20, %v1584_v24  ;;  %v1549_v50 = vmax.f32 %v1547_v41, %v1548_v39  ;;  %v1583_v53 = vsel %vm1582_vm8, %v1497_v17, %v1581_v47 }
 0x2ef   :  { %v1538_v51 = vrot.slane %v1537_v14, 1  ;;  %v1586_v54 = vsel %vm1574_vm3, %v1525_v27, %v1585_v21  ;;  %v1542_v5 = vmax.f32 %v1540_v32, %v1541_v29  ;;  %v1593_v55 = vmax.f32 %v1440_v40, %v1583_v53 }
 0x2f0   :  { %v1531_v31 = vrot.slane %v1530_v48, 1  ;;  %v1550_v52 = vrot.slane %v1549_v50, 2 }
 0x2f1   :  { %v1543_v58 = vrot.slane %v1542_v5, 2  ;;  %1595 = vst [vmem:[#allocation2] sm:$0xff] %v1593_v55  ;;  %v1539_v3 = vmax.f32 %v1537_v14, %v1538_v51 }
 0x2f2   :  { %v1532_v15 = vmax.f32 %v1530_v48, %v1531_v31  ;;  %v1551_v59 = vmax.f32 %v1549_v50, %v1550_v52 }
 0x2f3   :  { %v1544_v22 = vmax.f32 %v1542_v5, %v1543_v58 }
 0x2f4   :  { %v1587_v26 = vsel %vm1576_vm6, %v1532_v15, %v1586_v54  ;;  %v1552_v4 = vrot.slane %v1551_v59, 1 }
 0x2f5   :  { %v1545_v60 = vrot.slane %v1544_v22, 1  ;;  %v1588_v61 = vsel %vm1578_vm7, %v1539_v3, %v1587_v26 }
 0x2f6   :  { %v1553_v24 = vmax.f32 %v1551_v59, %v1552_v4 }
 0x2f7   :  { %v1546_v35 = vmax.f32 %v1544_v22, %v1545_v60 }
 0x2f9   :  { %v1589_v0 = vsel %vm1580_vm5, %v1546_v35, %v1588_v61 }
 0x2fa   :  { %v1590_v2 = vsel %vm1582_vm8, %v1553_v24, %v1589_v0 }
 0x2fb   :  { %v1594_v7 = vmax.f32 %v1441_v63, %v1590_v2 }
 0x2fd   :  { %1596 = vst [vmem:[#allocation2 + $0x8] sm:$0xff] %v1594_v7 }
 0x2fe PF:  { %1819 = vset.pattern.permute.xlu0 %v1922_v1  ;;  %v1600_v57 = vld [vmem:[%s2551_s4] sm:$0xff]  ;;  %v1601_v33 = vld [vmem:[%s2551_s4 + $0x8] sm:$0xff]  ;;  %s1929_s4 = smov [#allocation12]  }
 0x2ff   :  { %vm1602_vm9 = vcmp.gt.f32.partialorder %v1600_v57, 0.5  ;;  %vm1603_vm10 = vcmp.gt.f32.partialorder %v1601_v33, 0.5  ;;  %v1604_v36 = vld [vmem:[#allocation2] sm:$0xff]  ;;  %s1644_s23 = sshll.u32 %s1929_s4, 4  ;;  %s1645_s23 = int_to_ptr.vmem [resolvable:$true] %s1644_s23 }
 0x300   :  { %v1615_v6 = vsel %vm1602_vm9, 1, %v1922_v1  ;;  %v1616_v30 = vsel %vm1603_vm10, 1, %v1922_v1  ;;  %v1682_v8 = vld [vmem:[%s2555_s8] ss:$0 sm:$0xff]  ;;  %s1886_s25 = scalar_lea.vmem %s1645_s23, 128  ;;  %p1891_p12 = scmp.lt.s32.totalorder %s1645_s23, %s1645_s23 }
 0x301   :  { %1618 = vperm.xlu0 %1819, %v1615_v6   ;;  %v1613_v62 = vadd.f32 %v1682_v8, %v1604_v36  ;;  %p1887_p11 = scmp.ne.s32.totalorder %s1645_s23, %s1886_s25  ;;  %p1892_p13 = scmp.lt.s32.totalorder %s1886_s25, %s1886_s25 }
 0x303   :  { %p1893_p0 = por %p1892_p13, %p1891_p12 }
 0x304   :  { %v1605_v17 = vld [vmem:[#allocation2 + $0x8] sm:$0xff] }
 0x305   :  { %1621 = vperm.xlu0 %1819, %v1616_v30   ;;  %v1614_v49 = vadd.f32 %v1682_v8, %v1605_v17  ;;  %p1894_p1 = pnand %p1893_p0, %p1887_p11 }
 0x380   :  { %v1619_v9 = vpop.permute.xlu0 %1618 }
 0x381   :  { %vm1623_vm11 = vcmp.eq.s32.totalorder %v1619_v9, 1 }
 0x382   :  { %v1625_v10 = vsel %vm1623_vm11, %v1613_v62, 0.0 }
 0x383   :  { %v1627_v19 = vmax.f32 %v1625_v10, 0.0 }
 0x384   :  { %v1622_v13 = vpop.permute.xlu0 %1621 }
 0x385   :  { %vm1624_vm13 = vcmp.eq.s32.totalorder %v1622_v13, 1 }
 0x386   :  { %v1626_v18 = vsel %vm1624_vm13, %v1614_v49, 0.0 }
 0x387   :  { %v1628_v56 = vmax.f32 %v1626_v18, 0.0 }
 0x389   :  { %v1690_v1 = vpack.c.bf16 %v1628_v56, %v1627_v19 }
 0x38b   :  { %1691 = vst [vmem:[#allocation12] sm:$0xff] %v1690_v1  }
 0x38c   :  { %1897 = shalt.err (!%p1894_p1)
}
 0x38d   :  { %s1898_s27 = scalar_lea.hbm %s2556_s9, 128 }
 0x38e   :  { %p1899_p2 = scmp.ne.s32.totalorder %s2556_s9, %s1898_s27  ;;  %p1902_p3 = scmp.lt.u32.totalorder %s1898_s27, %s2556_s9 }
 0x390   :  { %p1904_p4 = pnand %p1902_p3, %p1899_p2 }
 0x392   :  { %1907 = shalt.err (!%p1904_p4)
}
 0x393   :  { %1650 = dma.vmem_to_hbm [thread:$0]  %s1645_s23, 128, %s2556_s9, [#allocation8], %s1915_s19, %s1915_s19, %s1916_s20  }
 0x394   :  { %1912 = dma.done.wait [#allocation8], 128  }
 0x395   :  { %1913 = vsyncadd [#allocation8], 4294967168 }
 0x396   :  { %1654 = vsyncpa [#allocation7], 1 }
 0x397   :  { %1655 = vsyncpa [#allocation10], 1 }
 0x398   :  { %1656 = vsyncpa [#allocation8], 1 }

</bundles_post_ra>
